<compile_context>
chip_gen: v6e
topology: v6e:2x2x1
jax: 0.10.0
libtpu: 0.0.40
codegen_flags: <defaults>
</compile_context>

<pallas_src>
import functools

import jax
import jax.numpy as jnp
from jax.experimental import pallas as pl
from jax.experimental.pallas import tpu as pltpu


# ----------------------------------------------------------------------------
# Tiling heuristics
# ----------------------------------------------------------------------------
def _vmem_bytes_estimate(tb, Sa, Sb, D, H):
    """Rough per-step VMEM bytes (f32-conservative, incl. double buffering)."""
    io_tiles = tb * (Sa + Sb) * D * 4 * 2          # A,B in + beta,alpha out
    io_tiles *= 2                                  # BlockSpec double buffering
    weights = (D * H + H * H + 2 * H) * 4
    mlp = tb * (Sa + Sb) * H * 4 * 2               # hidden activations
    scores = tb * Sa * Sb * 4 * 3                  # e / p / transients
    return io_tiles + weights + mlp + scores


def _pick_batch_tile(Bt, Sa, Sb, D, H, *, max_tile=8, vmem_budget=8 << 20):
    """Pick the batch tile.

    Preference order (per review): fits a conservative VMEM budget, stays at
    or below 8 batches per step (vreg pressure), enables lane-dense output
    packing (tile multiple of 8), keeps the grid >= 4 and even (v7x megacore
    pipelining), then as large as possible up to max_tile.
    """
    if Sa % 8 or Sb % 8:
        return 1                      # keep in-kernel reshapes trivially aligned
    divisors = [t for t in range(1, Bt + 1) if Bt % t == 0]

    def score(tb):
        grid = Bt // tb
        fits = _vmem_bytes_estimate(tb, Sa, Sb, D, H) <= vmem_budget
        packable = ((tb % 8 == 0 or tb == Bt)
                    and (Sa * D) % 128 == 0 and (Sb * D) % 128 == 0)
        return (fits, tb <= max_tile, packable and grid >= 2, grid >= 4,
                grid % 2 == 0 or grid == 1, -abs(tb - max_tile))

    return max(divisors, key=score)


# ----------------------------------------------------------------------------
# Kernel
# ----------------------------------------------------------------------------
def _attend_kernel(a_ref, b_ref, w1_ref, b1_ref, w2_ref, b2_ref,
                   beta_ref, alpha_ref, *, mxu_dtype, pack_out):
    TB, Sa, D = a_ref.shape
    _, Sb, _ = b_ref.shape
    H = w1_ref.shape[1]
    na, nb = TB * Sa, TB * Sb

    w1 = w1_ref[...]          # already mxu_dtype (wrapper-side cast)
    w2 = w2_ref[...]
    bias1 = b1_ref[...]       # (1, H) f32, implicit row broadcast
    bias2 = b2_ref[...]       # (1, H) f32

    def mlp2(x2):
        # x2: (N, D) in mxu_dtype.  f32 accumulation; bias/ReLU stay f32.
        h = jnp.dot(x2, w1, preferred_element_type=jnp.float32) + bias1
        h = jnp.maximum(h, 0.0)
        h = jnp.dot(h.astype(mxu_dtype), w2,
                    preferred_element_type=jnp.float32) + bias2
        return jnp.maximum(h, 0.0)

    # Fold (TB, S, D) -> (TB*S, D) so the MXU sees M = TB*S.  Reshapes stay
    # in the input dtype (f32) so they are sublane-aligned shape casts.
    a2 = a_ref[...].reshape(na, D)
    b2rows = b_ref[...].reshape(nb, D)

    if na % 8 == 0 and nb % 8 == 0:
        # Fused MLP over A- and B-rows: one matmul chain instead of two.
        h = mlp2(jnp.concatenate([a2, b2rows], axis=0).astype(mxu_dtype))
        f_a = h[:na].reshape(TB, Sa, H).astype(mxu_dtype)     # (TB, Sa, H)
        f_b = h[na:].reshape(TB, Sb, H).astype(mxu_dtype)     # (TB, Sb, H)
    else:
        f_a = mlp2(a2.astype(mxu_dtype)).reshape(TB, Sa, H).astype(mxu_dtype)
        f_b = mlp2(b2rows.astype(mxu_dtype)).reshape(TB, Sb, H).astype(mxu_dtype)

    def softmax_attend(x, y, v):
        """softmax_j( x[b,i,:] . y[b,j,:] ) @ v  ->  (TB, I, Dv), f32."""
        s = jnp.einsum("bih,bjh->bij", x, y,
                       preferred_element_type=jnp.float32)
        m = jnp.max(s, axis=-1, keepdims=True)
        p = jnp.exp(s - m)                                   # f32 elementwise
        den = jnp.sum(p, axis=-1, keepdims=True)
        r = pl.reciprocal(den, approx=True)                  # EUP slot (free)
        r = r * (2.0 - den * r)                              # Newton: ~exact
        p = p * r
        return jnp.einsum("bij,bjd->bid", p.astype(mxu_dtype), v,
                          preferred_element_type=jnp.float32)

    def store(out_ref, val):
        if pack_out:
            # Lane-dense output: pack (TB, S, D) -> (TB, S*D) with static
            # lane-offset stores so the HBM writeback is dense (D=16 alone
            # would be 16/128-lane masked partial stores).
            for q in range(val.shape[1]):
                out_ref[:, q * D:(q + 1) * D] = val[:, q, :].astype(out_ref.dtype)
        else:
            out_ref[...] = val.astype(out_ref.dtype)

    # beta first, fully stored before alpha starts (shorter live ranges);
    # values are re-read from the VMEM refs at their point of use and "e^T"
    # is obtained by swapping operands (no XLU transpose).
    store(beta_ref, softmax_attend(f_a, f_b, b_ref[...].astype(mxu_dtype)))
    store(alpha_ref, softmax_attend(f_b, f_a, a_ref[...].astype(mxu_dtype)))


# ----------------------------------------------------------------------------
# Wrapper
# ----------------------------------------------------------------------------
def attend(A, B, W1, b1, W2, b2, *, block_b=None, mxu_dtype=None, pack_out=None):
    """A: (Bt, Sa, D), B: (Bt, Sb, D).  Returns (beta, alpha)."""
    Bt, Sa, D = A.shape
    _, Sb, _ = B.shape
    H = W1.shape[1]
    out_dtype = A.dtype

    if mxu_dtype is None:
        mxu_dtype = A.dtype            # f32 default: matches PyTorch numerics
    if block_b is None:
        block_b = _pick_batch_tile(Bt, Sa, Sb, D, H)
    assert Bt % block_b == 0, "batch must be divisible by the batch tile"

    # Lane-dense packing only when the packed row is whole 128-lane tiles and
    # the 2-D packed block satisfies the (8, 128) second-minor rule.
    if pack_out is None:
        pack_out = ((Sa * D) % 128 == 0 and (Sb * D) % 128 == 0
                    and (block_b % 8 == 0 or block_b == Bt))

    # Wrapper-side weight casts: no per-step VPU cast, half the weight DMA
    # bytes on the bf16 path.  Biases stay f32 (added post f32 accumulation).
    W1_in = W1.astype(mxu_dtype)
    W2_in = W2.astype(mxu_dtype)
    b1_in = b1.reshape(1, H).astype(jnp.float32)
    b2_in = b2.reshape(1, H).astype(jnp.float32)

    grid = (Bt // block_b,)
    if pack_out:
        out_shapes = (jax.ShapeDtypeStruct((Bt, Sa * D), out_dtype),   # beta
                      jax.ShapeDtypeStruct((Bt, Sb * D), out_dtype))   # alpha
        out_specs = [pl.BlockSpec((block_b, Sa * D), lambda i: (i, 0)),
                     pl.BlockSpec((block_b, Sb * D), lambda i: (i, 0))]
    else:
        out_shapes = (jax.ShapeDtypeStruct((Bt, Sa, D), out_dtype),
                      jax.ShapeDtypeStruct((Bt, Sb, D), out_dtype))
        out_specs = [pl.BlockSpec((block_b, Sa, D), lambda i: (i, 0, 0)),
                     pl.BlockSpec((block_b, Sb, D), lambda i: (i, 0, 0))]

    kernel = functools.partial(_attend_kernel, mxu_dtype=mxu_dtype,
                               pack_out=pack_out)

    beta, alpha = pl.pallas_call(
        kernel,
        out_shape=out_shapes,
        grid_spec=pltpu.PrefetchScalarGridSpec(
            num_scalar_prefetch=0,
            grid=grid,
            in_specs=[
                pl.BlockSpec((block_b, Sa, D), lambda i: (i, 0, 0)),   # A
                pl.BlockSpec((block_b, Sb, D), lambda i: (i, 0, 0)),   # B
                # Constant index maps: tiny weight tiles fetched once and
                # never re-DMA'd across grid steps.
                pl.BlockSpec((D, H), lambda i: (0, 0)),                # W1
                pl.BlockSpec((1, H), lambda i: (0, 0)),                # b1
                pl.BlockSpec((H, H), lambda i: (0, 0)),                # W2
                pl.BlockSpec((1, H), lambda i: (0, 0)),                # b2
            ],
            out_specs=out_specs,
        ),
        compiler_params=pltpu.CompilerParams(
            dimension_semantics=("parallel",)),
    )(A, B, W1_in, b1_in, W2_in, b2_in)

    if pack_out:
        # Pure metadata views outside the kernel (row-major contiguous).
        beta = beta.reshape(Bt, Sa, D)
        alpha = alpha.reshape(Bt, Sb, D)
    return beta, alpha


# ----------------------------------------------------------------------------
# Pure-JAX reference (matches the PyTorch forward, eval mode)
# ----------------------------------------------------------------------------
def attend_ref(A, B, W1, b1, W2, b2):
    def f(x):
        h = jnp.maximum(x @ W1 + b1, 0.0)
        return jnp.maximum(h @ W2 + b2, 0.0)
    f_a, f_b = f(A), f(B)
    e = jnp.einsum("bqh,bkh->bqk", f_a, f_b)
    beta = jnp.einsum("bqk,bkd->bqd", jax.nn.softmax(e, axis=-1), B)
    alpha = jnp.einsum("bkq,bqd->bkd",
                       jax.nn.softmax(jnp.swapaxes(e, 1, 2), axis=-1), A)
    return beta, alpha


if __name__ == "__main__":
    key = jax.random.PRNGKey(0)
    batch, seq_a, seq_b = 32, 8, 8
    num_inputs, num_hiddens = 16, 32

    k_a, k_b, k_w1, k_b1, k_w2, k_b2 = jax.random.split(key, 6)
    A = jax.random.normal(k_a, (batch, seq_a, num_inputs), dtype=jnp.float32)
    B = jax.random.normal(k_b, (batch, seq_b, num_inputs), dtype=jnp.float32)

    # Deterministic parameter init (synthetic, not a checkpoint load).
    W1 = jax.random.normal(k_w1, (num_inputs, num_hiddens), jnp.float32) * 0.1
    b1 = jax.random.normal(k_b1, (num_hiddens,), jnp.float32) * 0.1
    W2 = jax.random.normal(k_w2, (num_inputs * 2, num_hiddens), jnp.float32)[:num_hiddens] * 0.1
    b2 = jax.random.normal(k_b2, (num_hiddens,), jnp.float32) * 0.1

    beta_r, alpha_r = attend_ref(A, B, W1, b1, W2, b2)

    # f32 MXU path (default; matches the PyTorch module numerics ~1e-3).
    beta, alpha = attend(A, B, W1, b1, W2, b2)
    jax.block_until_ready((beta, alpha))
    assert beta.shape == beta_r.shape and alpha.shape == alpha_r.shape
    assert jnp.allclose(beta, beta_r, atol=2e-3, rtol=2e-3)
    assert jnp.allclose(alpha, alpha_r, atol=2e-3, rtol=2e-3)

    # bf16 MXU-input / f32-accumulate path (recommended on v5e/v6e/v7x).
    beta16, alpha16 = attend(A, B, W1, b1, W2, b2, mxu_dtype=jnp.bfloat16)
    jax.block_until_ready((beta16, alpha16))
    assert jnp.allclose(beta16, beta_r, atol=1e-1, rtol=1e-1)
    assert jnp.allclose(alpha16, alpha_r, atol=1e-1, rtol=1e-1)

    print("KERNEL_OK")
</pallas_src>

<mosaic_0001>
module attributes {stable_mosaic.version = 11 : i64} {
  func.func @_attend_kernel(%arg0: i32, %arg1: memref<8x8x16xf32, #tpu.memory_space<vmem>>, %arg2: memref<8x8x16xf32, #tpu.memory_space<vmem>>, %arg3: memref<16x32xf32, #tpu.memory_space<vmem>>, %arg4: memref<1x32xf32, #tpu.memory_space<vmem>>, %arg5: memref<32x32xf32, #tpu.memory_space<vmem>>, %arg6: memref<1x32xf32, #tpu.memory_space<vmem>>, %arg7: memref<8x128xf32, #tpu.memory_space<vmem>>, %arg8: memref<8x128xf32, #tpu.memory_space<vmem>>) attributes {dimension_semantics = [#tpu.dimension_semantics<parallel>], iteration_bounds = array<i64: 4>, scalar_prefetch = 0 : i64, scratch_operands = 0 : i64, tpu.core_type = #tpu.core_type<tc>, window_params = [{transform_indices = @transform_0, window_bounds = array<i64: 8, 8, 16>}, {transform_indices = @transform_1, window_bounds = array<i64: 8, 8, 16>}, {pipeline_mode = #tpu.pipeline_mode<synchronous>, transform_indices = @transform_2, window_bounds = array<i64: 16, 32>}, {pipeline_mode = #tpu.pipeline_mode<synchronous>, transform_indices = @transform_3, window_bounds = array<i64: 1, 32>}, {pipeline_mode = #tpu.pipeline_mode<synchronous>, transform_indices = @transform_4, window_bounds = array<i64: 32, 32>}, {pipeline_mode = #tpu.pipeline_mode<synchronous>, transform_indices = @transform_5, window_bounds = array<i64: 1, 32>}, {transform_indices = @transform_6, window_bounds = array<i64: 8, 128>}, {transform_indices = @transform_7, window_bounds = array<i64: 8, 128>}]} {
    %c0 = arith.constant 0 : index
    %c0_0 = arith.constant 0 : index
    %0 = vector.load %arg3[%c0, %c0_0] : memref<16x32xf32, #tpu.memory_space<vmem>>, vector<16x32xf32>
    %c0_1 = arith.constant 0 : index
    %c0_2 = arith.constant 0 : index
    %1 = vector.load %arg5[%c0_1, %c0_2] : memref<32x32xf32, #tpu.memory_space<vmem>>, vector<32x32xf32>
    %c0_3 = arith.constant 0 : index
    %c0_4 = arith.constant 0 : index
    %2 = vector.load %arg4[%c0_3, %c0_4] : memref<1x32xf32, #tpu.memory_space<vmem>>, vector<1x32xf32>
    %c0_5 = arith.constant 0 : index
    %c0_6 = arith.constant 0 : index
    %3 = vector.load %arg6[%c0_5, %c0_6] : memref<1x32xf32, #tpu.memory_space<vmem>>, vector<1x32xf32>
    %c0_7 = arith.constant 0 : index
    %c0_8 = arith.constant 0 : index
    %c0_9 = arith.constant 0 : index
    %4 = vector.load %arg1[%c0_7, %c0_8, %c0_9] : memref<8x8x16xf32, #tpu.memory_space<vmem>>, vector<8x8x16xf32>
    %5 = vector.shape_cast %4 : vector<8x8x16xf32> to vector<64x16xf32>
    %c0_10 = arith.constant 0 : index
    %c0_11 = arith.constant 0 : index
    %c0_12 = arith.constant 0 : index
    %6 = vector.load %arg2[%c0_10, %c0_11, %c0_12] : memref<8x8x16xf32, #tpu.memory_space<vmem>>, vector<8x8x16xf32>
    %7 = vector.shape_cast %6 : vector<8x8x16xf32> to vector<64x16xf32>
    %8 = tpu.concatenate %5, %7 in 0 : vector<64x16xf32>, vector<64x16xf32> -> vector<128x16xf32>
    %cst = arith.constant dense<0.000000e+00> : vector<128x32xf32>
    %9 = tpu.matmul %8, %0, %cst {dimension_numbers = #tpu.dot_dimension_numbers<[1], [0], [0], [1], [0, 0, 1, 1], [], []>} : vector<128x16xf32>, vector<16x32xf32>, vector<128x32xf32> -> vector<128x32xf32>
    %10 = vector.broadcast %2 : vector<1x32xf32> to vector<128x32xf32>
    %11 = arith.addf %9, %10 : vector<128x32xf32>
    %cst_13 = arith.constant 0.000000e+00 : f32
    %12 = vector.broadcast %cst_13 : f32 to vector<128x32xf32>
    %13 = arith.maximumf %11, %12 : vector<128x32xf32>
    %cst_14 = arith.constant dense<0.000000e+00> : vector<128x32xf32>
    %14 = tpu.matmul %13, %1, %cst_14 {dimension_numbers = #tpu.dot_dimension_numbers<[1], [0], [0], [1], [0, 0, 1, 1], [], []>} : vector<128x32xf32>, vector<32x32xf32>, vector<128x32xf32> -> vector<128x32xf32>
    %15 = vector.broadcast %3 : vector<1x32xf32> to vector<128x32xf32>
    %16 = arith.addf %14, %15 : vector<128x32xf32>
    %cst_15 = arith.constant 0.000000e+00 : f32
    %17 = vector.broadcast %cst_15 : f32 to vector<128x32xf32>
    %18 = arith.maximumf %16, %17 : vector<128x32xf32>
    %19 = vector.extract_strided_slice %18 {offsets = [0, 0], sizes = [64, 32], strides = [1, 1]} : vector<128x32xf32> to vector<64x32xf32>
    %20 = vector.shape_cast %19 : vector<64x32xf32> to vector<8x8x32xf32>
    %21 = vector.extract_strided_slice %18 {offsets = [64, 0], sizes = [64, 32], strides = [1, 1]} : vector<128x32xf32> to vector<64x32xf32>
    %22 = vector.shape_cast %21 : vector<64x32xf32> to vector<8x8x32xf32>
    %c0_16 = arith.constant 0 : index
    %c0_17 = arith.constant 0 : index
    %c0_18 = arith.constant 0 : index
    %23 = vector.load %arg2[%c0_16, %c0_17, %c0_18] : memref<8x8x16xf32, #tpu.memory_space<vmem>>, vector<8x8x16xf32>
    "tpu.trace_start"() <{level = 10 : i32, message = "bih,bjh->bij"}> : () -> ()
    %cst_19 = arith.constant dense<0.000000e+00> : vector<8x8x8xf32>
    %24 = tpu.matmul %20, %22, %cst_19 {dimension_numbers = #tpu.dot_dimension_numbers<[2], [2], [1], [1], [0, 0, 0, 1, 1, 1], [0], [0]>} : vector<8x8x32xf32>, vector<8x8x32xf32>, vector<8x8x8xf32> -> vector<8x8x8xf32>
    "tpu.trace_stop"() : () -> ()
    %cst_20 = arith.constant dense<0xFF800000> : vector<8x8xf32>
    %25 = vector.multi_reduction <maximumf>, %24, %cst_20 [2] : vector<8x8x8xf32> to vector<8x8xf32>
    %26 = vector.shape_cast %25 : vector<8x8xf32> to vector<8x8x1xf32>
    %27 = vector.broadcast %26 : vector<8x8x1xf32> to vector<8x8x8xf32>
    %28 = arith.subf %24, %27 : vector<8x8x8xf32>
    %29 = math.exp %28 : vector<8x8x8xf32>
    %cst_21 = arith.constant dense<0.000000e+00> : vector<8x8xf32>
    %30 = vector.multi_reduction <add>, %29, %cst_21 [2] : vector<8x8x8xf32> to vector<8x8xf32>
    %31 = vector.shape_cast %30 : vector<8x8xf32> to vector<8x8x1xf32>
    %32 = tpu.reciprocal %31 {approx = true} : vector<8x8x1xf32> -> vector<8x8x1xf32>
    %33 = arith.mulf %31, %32 : vector<8x8x1xf32>
    %cst_22 = arith.constant 2.000000e+00 : f32
    %34 = vector.broadcast %cst_22 : f32 to vector<8x8x1xf32>
    %35 = arith.subf %34, %33 : vector<8x8x1xf32>
    %36 = arith.mulf %32, %35 : vector<8x8x1xf32>
    %37 = vector.broadcast %36 : vector<8x8x1xf32> to vector<8x8x8xf32>
    %38 = arith.mulf %29, %37 : vector<8x8x8xf32>
    "tpu.trace_start"() <{level = 10 : i32, message = "bij,bjd->bid"}> : () -> ()
    %cst_23 = arith.constant dense<0.000000e+00> : vector<8x8x16xf32>
    %39 = tpu.matmul %38, %23, %cst_23 {dimension_numbers = #tpu.dot_dimension_numbers<[2], [1], [1], [2], [0, 0, 0, 1, 1, 2], [0], [0]>} : vector<8x8x8xf32>, vector<8x8x16xf32>, vector<8x8x16xf32> -> vector<8x8x16xf32>
    "tpu.trace_stop"() : () -> ()
    %40 = vector.extract_strided_slice %39 {offsets = [0, 0, 0], sizes = [8, 1, 16], strides = [1, 1, 1]} : vector<8x8x16xf32> to vector<8x1x16xf32>
    %41 = vector.shape_cast %40 : vector<8x1x16xf32> to vector<8x16xf32>
    %c0_24 = arith.constant 0 : index
    %c0_25 = arith.constant 0 : index
    %42 = vector.load %arg7[%c0_24, %c0_25] : memref<8x128xf32, #tpu.memory_space<vmem>>, vector<8x16xf32>
    tpu.vector_store %arg7[%c0_24, %c0_25], %41 {strides = array<i32>} : memref<8x128xf32, #tpu.memory_space<vmem>>, vector<8x16xf32>,
    %43 = vector.extract_strided_slice %39 {offsets = [0, 1, 0], sizes = [8, 1, 16], strides = [1, 1, 1]} : vector<8x8x16xf32> to vector<8x1x16xf32>
    %44 = vector.shape_cast %43 : vector<8x1x16xf32> to vector<8x16xf32>
    %c0_26 = arith.constant 0 : index
    %c16 = arith.constant 16 : index
    %45 = vector.load %arg7[%c0_26, %c16] : memref<8x128xf32, #tpu.memory_space<vmem>>, vector<8x16xf32>
    tpu.vector_store %arg7[%c0_26, %c16], %44 {strides = array<i32>} : memref<8x128xf32, #tpu.memory_space<vmem>>, vector<8x16xf32>,
    %46 = vector.extract_strided_slice %39 {offsets = [0, 2, 0], sizes = [8, 1, 16], strides = [1, 1, 1]} : vector<8x8x16xf32> to vector<8x1x16xf32>
    %47 = vector.shape_cast %46 : vector<8x1x16xf32> to vector<8x16xf32>
    %c0_27 = arith.constant 0 : index
    %c32 = arith.constant 32 : index
    %48 = vector.load %arg7[%c0_27, %c32] : memref<8x128xf32, #tpu.memory_space<vmem>>, vector<8x16xf32>
    tpu.vector_store %arg7[%c0_27, %c32], %47 {strides = array<i32>} : memref<8x128xf32, #tpu.memory_space<vmem>>, vector<8x16xf32>,
    %49 = vector.extract_strided_slice %39 {offsets = [0, 3, 0], sizes = [8, 1, 16], strides = [1, 1, 1]} : vector<8x8x16xf32> to vector<8x1x16xf32>
    %50 = vector.shape_cast %49 : vector<8x1x16xf32> to vector<8x16xf32>
    %c0_28 = arith.constant 0 : index
    %c48 = arith.constant 48 : index
    %51 = vector.load %arg7[%c0_28, %c48] : memref<8x128xf32, #tpu.memory_space<vmem>>, vector<8x16xf32>
    tpu.vector_store %arg7[%c0_28, %c48], %50 {strides = array<i32>} : memref<8x128xf32, #tpu.memory_space<vmem>>, vector<8x16xf32>,
    %52 = vector.extract_strided_slice %39 {offsets = [0, 4, 0], sizes = [8, 1, 16], strides = [1, 1, 1]} : vector<8x8x16xf32> to vector<8x1x16xf32>
    %53 = vector.shape_cast %52 : vector<8x1x16xf32> to vector<8x16xf32>
    %c0_29 = arith.constant 0 : index
    %c64 = arith.constant 64 : index
    %54 = vector.load %arg7[%c0_29, %c64] : memref<8x128xf32, #tpu.memory_space<vmem>>, vector<8x16xf32>
    tpu.vector_store %arg7[%c0_29, %c64], %53 {strides = array<i32>} : memref<8x128xf32, #tpu.memory_space<vmem>>, vector<8x16xf32>,
    %55 = vector.extract_strided_slice %39 {offsets = [0, 5, 0], sizes = [8, 1, 16], strides = [1, 1, 1]} : vector<8x8x16xf32> to vector<8x1x16xf32>
    %56 = vector.shape_cast %55 : vector<8x1x16xf32> to vector<8x16xf32>
    %c0_30 = arith.constant 0 : index
    %c80 = arith.constant 80 : index
    %57 = vector.load %arg7[%c0_30, %c80] : memref<8x128xf32, #tpu.memory_space<vmem>>, vector<8x16xf32>
    tpu.vector_store %arg7[%c0_30, %c80], %56 {strides = array<i32>} : memref<8x128xf32, #tpu.memory_space<vmem>>, vector<8x16xf32>,
    %58 = vector.extract_strided_slice %39 {offsets = [0, 6, 0], sizes = [8, 1, 16], strides = [1, 1, 1]} : vector<8x8x16xf32> to vector<8x1x16xf32>
    %59 = vector.shape_cast %58 : vector<8x1x16xf32> to vector<8x16xf32>
    %c0_31 = arith.constant 0 : index
    %c96 = arith.constant 96 : index
    %60 = vector.load %arg7[%c0_31, %c96] : memref<8x128xf32, #tpu.memory_space<vmem>>, vector<8x16xf32>
    tpu.vector_store %arg7[%c0_31, %c96], %59 {strides = array<i32>} : memref<8x128xf32, #tpu.memory_space<vmem>>, vector<8x16xf32>,
    %61 = vector.extract_strided_slice %39 {offsets = [0, 7, 0], sizes = [8, 1, 16], strides = [1, 1, 1]} : vector<8x8x16xf32> to vector<8x1x16xf32>
    %62 = vector.shape_cast %61 : vector<8x1x16xf32> to vector<8x16xf32>
    %c0_32 = arith.constant 0 : index
    %c112 = arith.constant 112 : index
    %63 = vector.load %arg7[%c0_32, %c112] : memref<8x128xf32, #tpu.memory_space<vmem>>, vector<8x16xf32>
    tpu.vector_store %arg7[%c0_32, %c112], %62 {strides = array<i32>} : memref<8x128xf32, #tpu.memory_space<vmem>>, vector<8x16xf32>,
    %c0_33 = arith.constant 0 : index
    %c0_34 = arith.constant 0 : index
    %c0_35 = arith.constant 0 : index
    %64 = vector.load %arg1[%c0_33, %c0_34, %c0_35] : memref<8x8x16xf32, #tpu.memory_space<vmem>>, vector<8x8x16xf32>
    "tpu.trace_start"() <{level = 10 : i32, message = "bih,bjh->bij"}> : () -> ()
    %cst_36 = arith.constant dense<0.000000e+00> : vector<8x8x8xf32>
    %65 = tpu.matmul %22, %20, %cst_36 {dimension_numbers = #tpu.dot_dimension_numbers<[2], [2], [1], [1], [0, 0, 0, 1, 1, 1], [0], [0]>} : vector<8x8x32xf32>, vector<8x8x32xf32>, vector<8x8x8xf32> -> vector<8x8x8xf32>
    "tpu.trace_stop"() : () -> ()
    %cst_37 = arith.constant dense<0xFF800000> : vector<8x8xf32>
    %66 = vector.multi_reduction <maximumf>, %65, %cst_37 [2] : vector<8x8x8xf32> to vector<8x8xf32>
    %67 = vector.shape_cast %66 : vector<8x8xf32> to vector<8x8x1xf32>
    %68 = vector.broadcast %67 : vector<8x8x1xf32> to vector<8x8x8xf32>
    %69 = arith.subf %65, %68 : vector<8x8x8xf32>
    %70 = math.exp %69 : vector<8x8x8xf32>
    %cst_38 = arith.constant dense<0.000000e+00> : vector<8x8xf32>
    %71 = vector.multi_reduction <add>, %70, %cst_38 [2] : vector<8x8x8xf32> to vector<8x8xf32>
    %72 = vector.shape_cast %71 : vector<8x8xf32> to vector<8x8x1xf32>
    %73 = tpu.reciprocal %72 {approx = true} : vector<8x8x1xf32> -> vector<8x8x1xf32>
    %74 = arith.mulf %72, %73 : vector<8x8x1xf32>
    %cst_39 = arith.constant 2.000000e+00 : f32
    %75 = vector.broadcast %cst_39 : f32 to vector<8x8x1xf32>
    %76 = arith.subf %75, %74 : vector<8x8x1xf32>
    %77 = arith.mulf %73, %76 : vector<8x8x1xf32>
    %78 = vector.broadcast %77 : vector<8x8x1xf32> to vector<8x8x8xf32>
    %79 = arith.mulf %70, %78 : vector<8x8x8xf32>
    "tpu.trace_start"() <{level = 10 : i32, message = "bij,bjd->bid"}> : () -> ()
    %cst_40 = arith.constant dense<0.000000e+00> : vector<8x8x16xf32>
    %80 = tpu.matmul %79, %64, %cst_40 {dimension_numbers = #tpu.dot_dimension_numbers<[2], [1], [1], [2], [0, 0, 0, 1, 1, 2], [0], [0]>} : vector<8x8x8xf32>, vector<8x8x16xf32>, vector<8x8x16xf32> -> vector<8x8x16xf32>
    "tpu.trace_stop"() : () -> ()
    %81 = vector.extract_strided_slice %80 {offsets = [0, 0, 0], sizes = [8, 1, 16], strides = [1, 1, 1]} : vector<8x8x16xf32> to vector<8x1x16xf32>
    %82 = vector.shape_cast %81 : vector<8x1x16xf32> to vector<8x16xf32>
    %c0_41 = arith.constant 0 : index
    %c0_42 = arith.constant 0 : index
    %83 = vector.load %arg8[%c0_41, %c0_42] : memref<8x128xf32, #tpu.memory_space<vmem>>, vector<8x16xf32>
    tpu.vector_store %arg8[%c0_41, %c0_42], %82 {strides = array<i32>} : memref<8x128xf32, #tpu.memory_space<vmem>>, vector<8x16xf32>,
    %84 = vector.extract_strided_slice %80 {offsets = [0, 1, 0], sizes = [8, 1, 16], strides = [1, 1, 1]} : vector<8x8x16xf32> to vector<8x1x16xf32>
    %85 = vector.shape_cast %84 : vector<8x1x16xf32> to vector<8x16xf32>
    %c0_43 = arith.constant 0 : index
    %c16_44 = arith.constant 16 : index
    %86 = vector.load %arg8[%c0_43, %c16_44] : memref<8x128xf32, #tpu.memory_space<vmem>>, vector<8x16xf32>
    tpu.vector_store %arg8[%c0_43, %c16_44], %85 {strides = array<i32>} : memref<8x128xf32, #tpu.memory_space<vmem>>, vector<8x16xf32>,
    %87 = vector.extract_strided_slice %80 {offsets = [0, 2, 0], sizes = [8, 1, 16], strides = [1, 1, 1]} : vector<8x8x16xf32> to vector<8x1x16xf32>
    %88 = vector.shape_cast %87 : vector<8x1x16xf32> to vector<8x16xf32>
    %c0_45 = arith.constant 0 : index
    %c32_46 = arith.constant 32 : index
    %89 = vector.load %arg8[%c0_45, %c32_46] : memref<8x128xf32, #tpu.memory_space<vmem>>, vector<8x16xf32>
    tpu.vector_store %arg8[%c0_45, %c32_46], %88 {strides = array<i32>} : memref<8x128xf32, #tpu.memory_space<vmem>>, vector<8x16xf32>,
    %90 = vector.extract_strided_slice %80 {offsets = [0, 3, 0], sizes = [8, 1, 16], strides = [1, 1, 1]} : vector<8x8x16xf32> to vector<8x1x16xf32>
    %91 = vector.shape_cast %90 : vector<8x1x16xf32> to vector<8x16xf32>
    %c0_47 = arith.constant 0 : index
    %c48_48 = arith.constant 48 : index
    %92 = vector.load %arg8[%c0_47, %c48_48] : memref<8x128xf32, #tpu.memory_space<vmem>>, vector<8x16xf32>
    tpu.vector_store %arg8[%c0_47, %c48_48], %91 {strides = array<i32>} : memref<8x128xf32, #tpu.memory_space<vmem>>, vector<8x16xf32>,
    %93 = vector.extract_strided_slice %80 {offsets = [0, 4, 0], sizes = [8, 1, 16], strides = [1, 1, 1]} : vector<8x8x16xf32> to vector<8x1x16xf32>
    %94 = vector.shape_cast %93 : vector<8x1x16xf32> to vector<8x16xf32>
    %c0_49 = arith.constant 0 : index
    %c64_50 = arith.constant 64 : index
    %95 = vector.load %arg8[%c0_49, %c64_50] : memref<8x128xf32, #tpu.memory_space<vmem>>, vector<8x16xf32>
    tpu.vector_store %arg8[%c0_49, %c64_50], %94 {strides = array<i32>} : memref<8x128xf32, #tpu.memory_space<vmem>>, vector<8x16xf32>,
    %96 = vector.extract_strided_slice %80 {offsets = [0, 5, 0], sizes = [8, 1, 16], strides = [1, 1, 1]} : vector<8x8x16xf32> to vector<8x1x16xf32>
    %97 = vector.shape_cast %96 : vector<8x1x16xf32> to vector<8x16xf32>
    %c0_51 = arith.constant 0 : index
    %c80_52 = arith.constant 80 : index
    %98 = vector.load %arg8[%c0_51, %c80_52] : memref<8x128xf32, #tpu.memory_space<vmem>>, vector<8x16xf32>
    tpu.vector_store %arg8[%c0_51, %c80_52], %97 {strides = array<i32>} : memref<8x128xf32, #tpu.memory_space<vmem>>, vector<8x16xf32>,
    %99 = vector.extract_strided_slice %80 {offsets = [0, 6, 0], sizes = [8, 1, 16], strides = [1, 1, 1]} : vector<8x8x16xf32> to vector<8x1x16xf32>
    %100 = vector.shape_cast %99 : vector<8x1x16xf32> to vector<8x16xf32>
    %c0_53 = arith.constant 0 : index
    %c96_54 = arith.constant 96 : index
    %101 = vector.load %arg8[%c0_53, %c96_54] : memref<8x128xf32, #tpu.memory_space<vmem>>, vector<8x16xf32>
    tpu.vector_store %arg8[%c0_53, %c96_54], %100 {strides = array<i32>} : memref<8x128xf32, #tpu.memory_space<vmem>>, vector<8x16xf32>,
    %102 = vector.extract_strided_slice %80 {offsets = [0, 7, 0], sizes = [8, 1, 16], strides = [1, 1, 1]} : vector<8x8x16xf32> to vector<8x1x16xf32>
    %103 = vector.shape_cast %102 : vector<8x1x16xf32> to vector<8x16xf32>
    %c0_55 = arith.constant 0 : index
    %c112_56 = arith.constant 112 : index
    %104 = vector.load %arg8[%c0_55, %c112_56] : memref<8x128xf32, #tpu.memory_space<vmem>>, vector<8x16xf32>
    tpu.vector_store %arg8[%c0_55, %c112_56], %103 {strides = array<i32>} : memref<8x128xf32, #tpu.memory_space<vmem>>, vector<8x16xf32>,
    return
  }
  func.func @transform_0(%arg0: i32) -> (i32, i32, i32) {
    %c0_i32 = arith.constant 0 : i32
    %c0_i32_0 = arith.constant 0 : i32
    %c0_i32_1 = arith.constant 0 : i32
    return %arg0, %c0_i32, %c0_i32_0 : i32, i32, i32
  }
  func.func @transform_1(%arg0: i32) -> (i32, i32, i32) {
    %c0_i32 = arith.constant 0 : i32
    %c0_i32_0 = arith.constant 0 : i32
    %c0_i32_1 = arith.constant 0 : i32
    return %arg0, %c0_i32, %c0_i32_0 : i32, i32, i32
  }
  func.func @transform_2(%arg0: i32) -> (i32, i32) {
    %c0_i32 = arith.constant 0 : i32
    %c0_i32_0 = arith.constant 0 : i32
    %c0_i32_1 = arith.constant 0 : i32
    return %c0_i32, %c0_i32_0 : i32, i32
  }
  func.func @transform_3(%arg0: i32) -> (i32, i32) {
    %c0_i32 = arith.constant 0 : i32
    %c0_i32_0 = arith.constant 0 : i32
    %c0_i32_1 = arith.constant 0 : i32
    return %c0_i32, %c0_i32_0 : i32, i32
  }
  func.func @transform_4(%arg0: i32) -> (i32, i32) {
    %c0_i32 = arith.constant 0 : i32
    %c0_i32_0 = arith.constant 0 : i32
    %c0_i32_1 = arith.constant 0 : i32
    return %c0_i32, %c0_i32_0 : i32, i32
  }
  func.func @transform_5(%arg0: i32) -> (i32, i32) {
    %c0_i32 = arith.constant 0 : i32
    %c0_i32_0 = arith.constant 0 : i32
    %c0_i32_1 = arith.constant 0 : i32
    return %c0_i32, %c0_i32_0 : i32, i32
  }
  func.func @transform_6(%arg0: i32) -> (i32, i32) {
    %c0_i32 = arith.constant 0 : i32
    %c0_i32_0 = arith.constant 0 : i32
    return %arg0, %c0_i32 : i32, i32
  }
  func.func @transform_7(%arg0: i32) -> (i32, i32) {
    %c0_i32 = arith.constant 0 : i32
    %c0_i32_0 = arith.constant 0 : i32
    return %arg0, %c0_i32 : i32, i32
  }
}

</mosaic_0001>

<bundles_post_ra>
// kernel: tpu_custom_call.1
= control target key start
LH: loop header
LB: loop body
LE: loop exit
PB: predicated region body
PF: predicated region fallthrough
CT: control target
= control target key end

     0   :  { %13 = vsyncpa [#allocation3], 0  ;;  %s5348_s0 = inlined_call_operand.vmem [shape: f32[32,8,16], index: 0, kind: input, shape index: {}]   ;;  %s5349_s1 = inlined_call_operand.vmem [shape: f32[32,8,16], index: 1, kind: input, shape index: {}]   ;;  %s5350_s2 = inlined_call_operand.vmem [shape: f32[16,32], index: 2, kind: input, shape index: {}]   ;;  %s5351_s3 = inlined_call_operand.vmem [shape: f32[1,32], index: 3, kind: input, shape index: {}]   ;;  %s5352_s4 = inlined_call_operand.vmem [shape: f32[32,32], index: 4, kind: input, shape index: {}]   ;;  %s5353_s5 = inlined_call_operand.vmem [shape: f32[1,32], index: 5, kind: input, shape index: {}]   ;;  %s5354_s6 = inlined_call_operand.hbm [shape: f32[32,128], index: 6, kind: output, shape index: {0}]   ;;  %s5355_s7 = inlined_call_operand.hbm [shape: f32[32,128], index: 7, kind: output, shape index: {1}]  }
   0x1   :  { %15 = vsyncpa [#allocation3 + $0x1], 0 }
   0x2   :  { %16 = vsyncpa [#allocation5], 0 }
   0x3   :  { %18 = vsyncpa [#allocation5 + $0x1], 0  ;;  %s4417_s24 = smov 0   ;;  %s4419_s25 = smov 0  }
   0x4   :  { %s4421_s26 = smov 0   ;;  %s4423_s27 = smov 0  }
   0x5 LB: > { %s4438_s28 = sadd.s32 4294967295, %s4364_s27   ;;  %s3737_s29 = sadd.s32 4294967294, %s4364_s27   ;;  %s4364_s27 = sphi %s4423_s27, %s5404_s27   ;;  %s4360_s26 = sphi %s4421_s26, %s5403_s26   ;;  %s4356_s25 = sphi %s4419_s25, %s5402_s25   ;;  %s4352_s24 = sphi %s4417_s24, %s5401_s24  }
   0x6   : > { %s4442_s30 = sadd.s32 1, %s4364_s27   ;;  %s167_s8 = sadd.s32 1, %s4360_s26 }
   0x7   : > { %s164_s9 = ssub.s32 %s4364_s27, %s4442_s30  ;;  %p177_p0 = scmp.ne.s32.totalorder %s4360_s26, %s4356_s25 }
   0x8   : > { %p165_p1 = scmp.eq.s32.totalorder %s164_s9, 0  ;;  %p178_p2 = scmp.eq.s32.totalorder %s4438_s28, 3 }
   0x9   : > { %p183_p3 = scmp.ne.s32.totalorder %s4356_s25, %s4352_s24  ;;  %p184_p4 = scmp.eq.s32.totalorder %s3737_s29, 3 }
   0xa   : > { %s4453_s10 = scalar_select %p165_p1, %s4360_s26, %s167_s8  }
   0xb   : > { %p4455_p5 = por %p178_p2, %p177_p0  ;;  %p4459_p6 = por %p184_p4, %p183_p3 }
   0xc   : > { %p3740_p7 = scmp.ge.s32.totalorder %s4364_s27, 1  ;;  %p258_p8 = scmp.lt.s32.totalorder %s4364_s27, 5 }
   0xe   : > { %p259_p9 = pnand %p3740_p7, %p258_p8 }
   0xf   : > { %s3743_s17 = sshll.u32 (!%p259_p9), %s4438_s28, 3  ;;  %s4368_s13 = smov (!%p259_p9), 16  }
  0x10   : > { %262 = sbr.rel (%p259_p9) target bundleno = 1858 (0x742), region = 44  ;;  %p301_p10 = scmp.lt.s32.totalorder (!%p259_p9), %s3743_s17, 31 }
  0x11   : > { %s4369_s14 = smov (!%p259_p9), 32   ;;  %s5377_s15 = smov (!%p259_p9), 48  }
  0x12   : > { %s4371_s16 = smov (!%p259_p9), 64   ;;  %s5373_s19 = smov (!%p259_p9), 112  }
  0x15   : > { %v313_v0 = vld [vmem:[%s5350_s2 + $0x8] sm:$0xff]  ;;  %v312_v1 = vld [vmem:[%s5350_s2] sm:$0xff]  ;;  %s5406_s17 = smov (!%p301_p10, %s3743_s17), 31  ;;  %vm342_vm0 = vcmask 130048   ;;  %v317_v18 = vld [vmem:[%s5352_s4 + $0x18] sm:$0xff]  ;;  %vm558_vm1 = vcmask 261120  }
  0x16   : > { %3937 = vmatprep.subr.mxu0 %v313_v0  ;;  %s3744_s18 = sshll.u32 %s5406_s17, 3  ;;  %3965 = vmatprep.subr.mxu1 %v317_v18  ;;  %v316_v19 = vld [vmem:[%s5352_s4 + $0x10] sm:$0xff]  ;;  %v315_v20 = vld [vmem:[%s5352_s4 + $0x8] sm:$0xff]  ;;  %v314_v21 = vld [vmem:[%s5352_s4] sm:$0xff]  ;;  %vm4367_vm2 = vmmov 0   ;;  %vm1376_vm3 = vcmask 64512  }
  0x17   : > { %3938 = vmatpush3.msra.mxu0 %v313_v0  ;;  %s4475_s21 = scalar_lea.vmem %s5348_s0, %s3744_s18  ;;  %s310_s29 = scalar_lea.vmem %s5349_s1, %s3744_s18  ;;  %3966 = vmatpush3.msra.mxu1 %v317_v18  ;;  %v3747_v22 = vld [vmem:[%s5351_s3] ss:$0 sm:$0xff]  ;;  %vm2085_vm4 = vcmask 1042434   ;;  %vm2088_vm5 = vcmask 1043459   ;;  %vm2091_vm6 = vcmask 1044484   ;;  %vm2094_vm7 = vcmask 1045509  }
  0x18   : > { %3939 = vmatprep.subr.mxu0 %v312_v1  ;;  %v320_v2 = vld [vmem:[%s4475_s21] sm:$0xff]  ;;  %v321_v3 = vld [vmem:[%s4475_s21 + $0x8] sm:$0xff]  ;;  %v322_v4 = vld [vmem:[%s4475_s21 + $0x10] sm:$0xff]  ;;  %3967 = vmatprep.subr.mxu1 %v316_v19  ;;  %vm2097_vm8 = vcmask 1046534   ;;  %vm2100_vm9 = vcmask 1047559   ;;  %vm2082_vm10 = vcmask 1041409  }
  0x19   : > { %3940 = vmatpush3.msra.mxu0 %v312_v1  ;;  %3941 = vmatprep.mubr.msk.f32.mxu0 %vm342_vm0, %v320_v2  ;;  %v323_v5 = vld [vmem:[%s4475_s21 + $0x18] sm:$0xff]  ;;  %v324_v6 = vld [vmem:[%s4475_s21 + $0x20] sm:$0xff]  ;;  %v325_v7 = vld [vmem:[%s4475_s21 + $0x28] sm:$0xff]  ;;  %s5375_s17 = smov 80   ;;  %s5372_s18 = smov 96   ;;  %vm5364_vm11 = vcmask 261249  }
  0x1a   : > { %3942 = vmatmul.mubr.msk.f32.vlgmr.msra.gmra.mxu0 %vm342_vm0, %v321_v3  ;;  %v326_v8 = vld [vmem:[%s4475_s21 + $0x30] sm:$0xff]  ;;  %v327_v9 = vld [vmem:[%s4475_s21 + $0x38] sm:$0xff]  ;;  %v4495_v10 = vld [vmem:[%s310_s29] sm:$0xff]  ;;  %3968 = vmatpush3.msra.mxu1 %v316_v19  ;;  %vm2118_vm12 = vcmask 254080   ;;  %vm2132_vm13 = vcmask 392450   ;;  %vm5370_vm14 = vcmask 523651  }
  0x1b   : > { %3944 = vmatprep.mubr.msk.f32.mxu0 %vm342_vm0, %v322_v4  ;;  %v4500_v11 = vld [vmem:[%s310_s29 + $0x8] sm:$0xff]  ;;  %v4502_v12 = vld [vmem:[%s310_s29 + $0x10] sm:$0xff]  ;;  %v4508_v13 = vld [vmem:[%s310_s29 + $0x18] sm:$0xff]  ;;  %3969 = vmatprep.subr.mxu1 %v315_v20  ;;  %vm5365_vm15 = vcmask 654852  }
  0x1c   : > { %v4510_v14 = vld [vmem:[%s310_s29 + $0x20] sm:$0xff]  ;;  %v4516_v15 = vld [vmem:[%s310_s29 + $0x28] sm:$0xff]  ;;  %v4518_v16 = vld [vmem:[%s310_s29 + $0x30] sm:$0xff]  ;;  %3970 = vmatpush3.msra.mxu1 %v315_v20 }
  0x1d   : > { %v4524_v17 = vld [vmem:[%s310_s29 + $0x38] sm:$0xff]  ;;  %3971 = vmatprep.subr.mxu1 %v314_v21  ;;  %s4904_s29 = sand.u32 1, %s4356_s25  }
  0x1e   : > { %3945 = vmatmul.mubr.msk.f32.gmra.mxu0 %vm342_vm0, %v323_v5  ;;  %3972 = vmatpush3.msra.mxu1 %v314_v21  ;;  %s3741_s8 = sshll.u32 %s4904_s29, 3 }
  0x1f   : > { %3947 = vmatprep.mubr.msk.f32.mxu0 %vm342_vm0, %v324_v6  ;;  %s4947_s9 = scalar_lea.vmem [#allocation2], %s3741_s8  ;;  %s5212_s20 = scalar_lea.vmem [#allocation4], %s3741_s8 }
  0x22   : > { %3948 = vmatmul.mubr.msk.f32.gmra.mxu0 %vm342_vm0, %v325_v7  ;;  %v4366_v7 = vmov 0.0  }
  0x23   : > { %3950 = vmatprep.mubr.msk.f32.mxu0 %vm342_vm0, %v326_v8  ;;  %3997 = vmatprep.subr.mxu0 %v4366_v7 }
  0x24   : > { %4007 = vmatprep.subr.mxu1 %v4366_v7 }
  0x26   : > { %3951 = vmatmul.mubr.msk.f32.gmra.mxu0 %vm342_vm0, %v327_v9 }
  0x27   : > { %3953 = vmatprep.mubr.msk.f32.mxu0 %vm342_vm0, %v4495_v10 }
  0x2a   : > { %3954 = vmatmul.mubr.msk.f32.gmra.mxu0 %vm342_vm0, %v4500_v11 }
  0x2b   : > { %3956 = vmatprep.mubr.msk.f32.mxu0 %vm342_vm0, %v4502_v12 }
  0x2e   : > { %3957 = vmatmul.mubr.msk.f32.gmra.mxu0 %vm342_vm0, %v4508_v13 }
  0x2f   : > { %3959 = vmatprep.mubr.msk.f32.mxu0 %vm342_vm0, %v4510_v14 }
  0x32   : > { %3960 = vmatmul.mubr.msk.f32.gmra.mxu0 %vm342_vm0, %v4516_v15 }
  0x33   : > { %3962 = vmatprep.mubr.msk.f32.mxu0 %vm342_vm0, %v4518_v16 }
  0x36   : > { %3963 = vmatmul.mubr.msk.f32.gmra.mxu0 %vm342_vm0, %v4524_v17 }
  0x37   : > { %3999 = vmatprep.mubr.msk.f32.mxu0 %vm4367_vm2, %v4366_v7 }
  0xda   : > { %v3943_v23 = vpop.f32.mrf.mxu0 }
  0xdb   : > { %v463_v24 = vadd.f32 %v3943_v23, %v3747_v22 }
  0xdc   : > { %v457_v25 = vpop.f32.mrf.mxu0 }
  0xdd   : > { %v458_v26 = vadd.f32 %v3747_v22, %v457_v25  ;;  %v537_v29 = vmax.f32 %v463_v24, 0.0  ;;  %v3764_v25 = vld [vmem:[%s5353_s5] ss:$0 sm:$0xff] }
  0xde   : > { %v3946_v27 = vpop.f32.mrf.mxu0 }
  0xdf   : > { %v536_v28 = vmax.f32 %v458_v26, 0.0  ;;  %v473_v30 = vadd.f32 %v3946_v27, %v3747_v22 }
  0xe0   : > { %v467_v31 = vpop.f32.mrf.mxu0 }
  0xe1   : > { %v468_v32 = vadd.f32 %v3747_v22, %v467_v31  ;;  %3973 = vmatprep.mubr.msk.f32.mxu1 %vm558_vm1, %v536_v28  ;;  %v539_v35 = vmax.f32 %v473_v30, 0.0 }
  0xe2   : > { %v3949_v33 = vpop.f32.mrf.mxu0  ;;  %3974 = vmatmul.mubr.msk.f32.vlgmr.msra.gmra.mxu1 %vm558_vm1, %v537_v29 }
  0xe3   : > { %v538_v34 = vmax.f32 %v468_v32, 0.0  ;;  %v483_v36 = vadd.f32 %v3949_v33, %v3747_v22 }
  0xe4   : > { %v477_v37 = vpop.f32.mrf.mxu0 }
  0xe5   : > { %v478_v38 = vadd.f32 %v3747_v22, %v477_v37  ;;  %3976 = vmatprep.mubr.msk.f32.mxu1 %vm558_vm1, %v538_v34  ;;  %v541_v41 = vmax.f32 %v483_v36, 0.0 }
  0xe6   : > { %v3952_v39 = vpop.f32.mrf.mxu0  ;;  %3977 = vmatmul.mubr.msk.f32.gmra.mxu1 %vm558_vm1, %v539_v35 }
  0xe7   : > { %v540_v40 = vmax.f32 %v478_v38, 0.0  ;;  %v493_v42 = vadd.f32 %v3952_v39, %v3747_v22 }
  0xe8   : > { %v487_v43 = vpop.f32.mrf.mxu0 }
  0xe9   : > { %v488_v44 = vadd.f32 %v3747_v22, %v487_v43  ;;  %3979 = vmatprep.mubr.msk.f32.mxu1 %vm558_vm1, %v540_v40  ;;  %v543_v47 = vmax.f32 %v493_v42, 0.0 }
  0xea   : > { %v3955_v45 = vpop.f32.mrf.mxu0  ;;  %3980 = vmatmul.mubr.msk.f32.gmra.mxu1 %vm558_vm1, %v541_v41 }
  0xeb   : > { %v542_v46 = vmax.f32 %v488_v44, 0.0  ;;  %v503_v48 = vadd.f32 %v3955_v45, %v3747_v22 }
  0xec   : > { %v497_v49 = vpop.f32.mrf.mxu0 }
  0xed   : > { %v498_v50 = vadd.f32 %v3747_v22, %v497_v49  ;;  %3982 = vmatprep.mubr.msk.f32.mxu1 %vm558_vm1, %v542_v46  ;;  %v545_v53 = vmax.f32 %v503_v48, 0.0 }
  0xee   : > { %v3958_v51 = vpop.f32.mrf.mxu0  ;;  %3983 = vmatmul.mubr.msk.f32.gmra.mxu1 %vm558_vm1, %v543_v47 }
  0xef   : > { %v544_v52 = vmax.f32 %v498_v50, 0.0  ;;  %v513_v54 = vadd.f32 %v3958_v51, %v3747_v22 }
  0xf0   : > { %v507_v55 = vpop.f32.mrf.mxu0 }
  0xf1   : > { %v508_v56 = vadd.f32 %v3747_v22, %v507_v55  ;;  %3985 = vmatprep.mubr.msk.f32.mxu1 %vm558_vm1, %v544_v52  ;;  %v547_v59 = vmax.f32 %v513_v54, 0.0 }
  0xf2   : > { %v3961_v57 = vpop.f32.mrf.mxu0  ;;  %3986 = vmatmul.mubr.msk.f32.gmra.mxu1 %vm558_vm1, %v545_v53 }
  0xf3   : > { %v546_v58 = vmax.f32 %v508_v56, 0.0  ;;  %v523_v60 = vadd.f32 %v3961_v57, %v3747_v22 }
  0xf4   : > { %v517_v61 = vpop.f32.mrf.mxu0 }
  0xf5   : > { %v518_v62 = vadd.f32 %v3747_v22, %v517_v61  ;;  %3988 = vmatprep.mubr.msk.f32.mxu1 %vm558_vm1, %v546_v58  ;;  %v549_v1 = vmax.f32 %v523_v60, 0.0 }
  0xf6   : > { %v3964_v63 = vpop.f32.mrf.mxu0  ;;  %3989 = vmatmul.mubr.msk.f32.gmra.mxu1 %vm558_vm1, %v547_v59 }
  0xf7   : > { %v548_v0 = vmax.f32 %v518_v62, 0.0  ;;  %v533_v2 = vadd.f32 %v3964_v63, %v3747_v22 }
  0xf8   : > { %v527_v3 = vpop.f32.mrf.mxu0 }
  0xf9   : > { %v528_v4 = vadd.f32 %v3747_v22, %v527_v3  ;;  %3991 = vmatprep.mubr.msk.f32.mxu1 %vm558_vm1, %v548_v0  ;;  %v551_v6 = vmax.f32 %v533_v2, 0.0 }
  0xfa   : > { %3992 = vmatmul.mubr.msk.f32.gmra.mxu1 %vm558_vm1, %v549_v1 }
  0xfb   : > { %v550_v5 = vmax.f32 %v528_v4, 0.0 }
  0xfd   : > { %3994 = vmatprep.mubr.msk.f32.mxu1 %vm558_vm1, %v550_v5 }
  0xfe   : > { %3995 = vmatmul.mubr.msk.f32.gmra.mxu1 %vm558_vm1, %v551_v6 }
  0xff   : > { %4009 = vmatprep.mubr.msk.f32.mxu1 %vm4367_vm2, %v4366_v7 }
 0x1a2   : > { %v3975_v8 = vpop.f32.mrf.mxu1 }
 0x1a3   : > { %v4580_v34 = vadd.f32 %v3975_v8, %v3764_v25 }
 0x1a4   : > { %v673_v9 = vpop.f32.mrf.mxu1 }
 0x1a5   : > { %v4570_v28 = vadd.f32 %v3764_v25, %v673_v9  ;;  %v753_v43 = vmax.f32 %v4580_v34, 0.0 }
 0x1a6   : > { %v3978_v18 = vpop.f32.mrf.mxu1 }
 0x1a7   : > { %v752_v35 = vmax.f32 %v4570_v28, 0.0  ;;  %v4602_v44 = vadd.f32 %v3978_v18, %v3764_v25 }
 0x1a8   : > { %v683_v19 = vpop.f32.mrf.mxu1 }
 0x1a9   : > { %v4583_v36 = vadd.f32 %v3764_v25, %v683_v19  ;;  %v755_v53 = vmax.f32 %v4602_v44, 0.0 }
 0x1aa   : > { %v3981_v20 = vpop.f32.mrf.mxu1 }
 0x1ab   : > { %v754_v45 = vmax.f32 %v4583_v36, 0.0  ;;  %v4630_v54 = vadd.f32 %v3981_v20, %v3764_v25 }
 0x1ac   : > { %v693_v21 = vpop.f32.mrf.mxu1 }
 0x1ad   : > { %v4605_v46 = vadd.f32 %v3764_v25, %v693_v21  ;;  %v5360_v60 = vmax.f32 %v4630_v54, 0.0 }
 0x1ae   : > { %v3984_v22 = vpop.f32.mrf.mxu1 }
 0x1af   : > { %v756_v55 = vmax.f32 %v4605_v46, 0.0  ;;  %v4658_v61 = vadd.f32 %v3984_v22, %v3764_v25 }
 0x1b0   : > { %v703_v23 = vpop.f32.mrf.mxu1 }
 0x1b1   : > { %v4633_v56 = vadd.f32 %v3764_v25, %v703_v23  ;;  %v5357_v0 = vmax.f32 %v4658_v61, 0.0  ;;  %v5386_v34 = vmax.f32 %v4658_v61, 0.0 }
 0x1b2   : > { %v3987_v24 = vpop.f32.mrf.mxu1 }
 0x1b3   : > { %v4572_v30 = vadd.f32 %v3987_v24, %v3764_v25  ;;  %v5361_v62 = vmax.f32 %v4633_v56, 0.0  ;;  %v5382_v28 = vmax.f32 %v4633_v56, 0.0 }
 0x1b4   : > { %v713_v26 = vpop.f32.mrf.mxu1 }
 0x1b5   : > { %v4568_v27 = vadd.f32 %v3764_v25, %v713_v26  ;;  %v761_v38 = vmax.f32 %v4572_v30, 0.0  ;;  %v5383_v30 = vmax.f32 %v4630_v54, 0.0 }
 0x1b6   : > { %v3990_v29 = vpop.f32.mrf.mxu1 }
 0x1b7   : > { %v760_v31 = vmax.f32 %v4568_v27, 0.0  ;;  %v4587_v39 = vadd.f32 %v3990_v29, %v3764_v25 }
 0x1b8   : > { %v723_v32 = vpop.f32.mrf.mxu1 }
 0x1b9   : > { %v4575_v33 = vadd.f32 %v3764_v25, %v723_v32  ;;  %3998 = vmatpush3.xpose.msk.msra.mxu0 %vm558_vm1, %v760_v31  ;;  %v5362_v48 = vmax.f32 %v4587_v39, 0.0  ;;  %v5381_v27 = vmax.f32 %v4587_v39, 0.0 }
 0x1ba   : > { %v3993_v37 = vpop.f32.mrf.mxu1  ;;  %4002 = vmatprep.subr.mxu0 %v4366_v7 }
 0x1bb   : > { %v762_v40 = vmax.f32 %v4575_v33, 0.0  ;;  %v4611_v49 = vadd.f32 %v3993_v37, %v3764_v25 }
 0x1bc   : > { %v733_v41 = vpop.f32.mrf.mxu1  ;;  %4000 = vmatmul.mubr.msk.f32.vlgmr.msra.gmra.mxu0 %vm558_vm1, %v752_v35 }
 0x1bd   : > { %v4593_v42 = vadd.f32 %v3764_v25, %v733_v41  ;;  %4003 = vmatpush3.xpose.msk.msra.mxu0 %vm558_vm1, %v761_v38  ;;  %4008 = vmatpush3.xpose.msk.msra.mxu1 %vm558_vm1, %v762_v40  ;;  %v5358_v57 = vmax.f32 %v4611_v49, 0.0  ;;  %v5385_v33 = vmax.f32 %v4611_v49, 0.0 }
 0x1be   : > { %v3996_v47 = vpop.f32.mrf.mxu1  ;;  %4004 = vmatprep.mubr.msk.f32.mxu0 %vm4367_vm2, %v4366_v7  ;;  %4012 = vmatprep.subr.mxu0 %v4366_v7 }
 0x1bf   : > { %v5363_v50 = vmax.f32 %v4593_v42, 0.0  ;;  %4017 = vmatprep.subr.mxu1 %v4366_v7  ;;  %v4640_v58 = vadd.f32 %v3996_v47, %v3764_v25 }
 0x1c0   : > { %v743_v51 = vpop.f32.mrf.mxu1  ;;  %4005 = vmatmul.mubr.msk.f32.vlgmr.msra.gmra.mxu0 %vm558_vm1, %v753_v43  ;;  %4010 = vmatmul.mubr.msk.f32.vlgmr.msra.gmra.mxu1 %vm558_vm1, %v754_v45 }
 0x1c1   : > { %v4621_v52 = vadd.f32 %v3764_v25, %v743_v51  ;;  %4013 = vmatpush3.xpose.msk.msra.mxu0 %vm558_vm1, %v5362_v48  ;;  %4018 = vmatpush3.xpose.msk.msra.mxu1 %vm558_vm1, %v5363_v50  ;;  %v5356_v63 = vmax.f32 %v4640_v58, 0.0 }
 0x1c2   : > { %4014 = vmatprep.mubr.msk.f32.mxu0 %vm4367_vm2, %v4366_v7  ;;  %4019 = vmatprep.mubr.msk.f32.mxu1 %vm4367_vm2, %v4366_v7 }
 0x1c3   : > { %v5359_v59 = vmax.f32 %v4621_v52, 0.0  ;;  %4022 = vmatprep.subr.mxu0 %v4366_v7  ;;  %4027 = vmatprep.subr.mxu1 %v4366_v7 }
 0x1c4   : > { %4015 = vmatmul.mubr.msk.f32.vlgmr.msra.gmra.mxu0 %vm558_vm1, %v755_v53  ;;  %4020 = vmatmul.mubr.msk.f32.vlgmr.msra.gmra.mxu1 %vm558_vm1, %v756_v55 }
 0x1c5   : > { %4023 = vmatpush3.xpose.msk.msra.mxu0 %vm558_vm1, %v5358_v57  ;;  %4028 = vmatpush3.xpose.msk.msra.mxu1 %vm558_vm1, %v5359_v59 }
 0x1c6   : > { %4024 = vmatprep.mubr.msk.f32.mxu0 %vm4367_vm2, %v4366_v7  ;;  %4029 = vmatprep.mubr.msk.f32.mxu1 %vm4367_vm2, %v4366_v7 }
 0x1c7   : > { %4032 = vmatprep.subr.mxu0 %v4366_v7  ;;  %4037 = vmatprep.subr.mxu1 %v4366_v7 }
 0x1c8   : > { %4025 = vmatmul.mubr.msk.f32.vlgmr.msra.gmra.mxu0 %vm558_vm1, %v5360_v60  ;;  %4030 = vmatmul.mubr.msk.f32.vlgmr.msra.gmra.mxu1 %vm558_vm1, %v5361_v62 }
 0x1c9   : > { %4033 = vmatpush3.xpose.msk.msra.mxu0 %vm558_vm1, %v5356_v63  ;;  %4034 = vmatprep.mubr.msk.f32.mxu0 %vm4367_vm2, %v4366_v7 }
 0x1ca   : > { %4038 = vmatpush3.msra.mxu1 %v4495_v10  ;;  %4039 = vmatprep.mubr.msk.f32.mxu1 %vm4367_vm2, %v4366_v7 }
 0x1cb   : > { %4042 = vmatprep.subr.mxu0 %v4366_v7  ;;  %4047 = vmatprep.subr.mxu1 %v4366_v7 }
 0x1cc   : > { %4035 = vmatmul.mubr.msk.f32.vlgmr.msra.gmra.mxu0 %vm558_vm1, %v5357_v0 }
 0x1cd   : > { %4043 = vmatpush3.msra.mxu0 %v4500_v11  ;;  %4044 = vmatprep.mubr.msk.f32.mxu0 %vm4367_vm2, %v4366_v7 }
 0x1ce   : > { %4052 = vmatprep.subr.mxu0 %v4366_v7 }
 0x27c   : > { %v840_v10 = vpop.f32.mrf.mxu0 }
 0x27d   : > { %v1377_v1 = vsel %vm1376_vm3, %v840_v10, -inf }
 0x27e   : > { %1378 = vmax.xlane.f32.xlu0 %v1377_v1  ;;  %v4001_v2 = vpop.f32.mrf.mxu0 }
 0x280   : > { %v916_v3 = vpop.f32.mrf.mxu0  ;;  %v992_v4 = vpop.f32.mrf.mxu1 }
 0x281   : > { %v1383_v5 = vsel %vm1376_vm3, %v992_v4, -inf  ;;  %v1380_v6 = vsel %vm1376_vm3, %v916_v3, -inf }
 0x282   : > { %1384 = vmax.xlane.f32.xlu1 %v1383_v5  ;;  %v4011_v8 = vpop.f32.mrf.mxu1  ;;  %1381 = vmax.xlane.f32.xlu0 %v1380_v6  ;;  %v4006_v11 = vpop.f32.mrf.mxu0 }
 0x284   : > { %v1068_v9 = vpop.f32.mrf.mxu0  ;;  %v1144_v18 = vpop.f32.mrf.mxu1 }
 0x285   : > { %v1389_v19 = vsel %vm1376_vm3, %v1144_v18, -inf  ;;  %v1386_v20 = vsel %vm1376_vm3, %v1068_v9, -inf }
 0x286   : > { %v4021_v21 = vpop.f32.mrf.mxu1  ;;  %1390 = vmax.xlane.f32.xlu0 %v1389_v19  ;;  %1387 = vmax.xlane.f32.xlu1 %v1386_v20  ;;  %v4016_v22 = vpop.f32.mrf.mxu0 }
 0x288   : > { %v1220_v23 = vpop.f32.mrf.mxu0  ;;  %v1296_v24 = vpop.f32.mrf.mxu1 }
 0x289   : > { %v1395_v25 = vsel %vm1376_vm3, %v1296_v24, -inf  ;;  %v1392_v26 = vsel %vm1376_vm3, %v1220_v23, -inf }
 0x28a   : > { %v4031_v29 = vpop.f32.mrf.mxu1  ;;  %1396 = vmax.xlane.f32.xlu0 %v1395_v25  ;;  %1393 = vmax.xlane.f32.xlu1 %v1392_v26  ;;  %v4026_v32 = vpop.f32.mrf.mxu0 }
 0x28c   : > { %v1372_v37 = vpop.f32.mrf.mxu0 }
 0x28d   : > { %v1398_v41 = vsel %vm1376_vm3, %v1372_v37, -inf }
 0x28e   : > { %1399 = vmax.xlane.f32.xlu1 %v1398_v41  ;;  %v4036_v47 = vpop.f32.mrf.mxu0 }
 0x307   : > { %v1379_v51 = vpop.xlane.xlu0 %1378 }
 0x308   : > { %v1401_v1 = vsub.f32 %v840_v10, %v1379_v51 }
 0x30a   : > { %v1409_v2 = vmul.f32 1.442695, %v1401_v1 }
 0x30b   : > { %v1385_v5 = vpop.xlane.xlu1 %1384  ;;  %v1382_v6 = vpop.xlane.xlu0 %1381 }
 0x30c   : > { %4210 = vpow2.f32 %v1409_v2  ;;  %v1403_v8 = vsub.f32 %v992_v4, %v1385_v5  ;;  %v1402_v11 = vsub.f32 %v916_v3, %v1382_v6 }
 0x30e   : > { %v1413_v19 = vmul.f32 1.442695, %v1403_v8  ;;  %v1411_v20 = vmul.f32 1.442695, %v1402_v11 }
 0x30f   : > { %v1391_v21 = vpop.xlane.xlu0 %1390  ;;  %v1388_v22 = vpop.xlane.xlu1 %1387 }
 0x310   : > { %4212 = vpow2.f32 %v1413_v19  ;;  %v1405_v25 = vsub.f32 %v1144_v18, %v1391_v21  ;;  %v1404_v26 = vsub.f32 %v1068_v9, %v1388_v22 }
 0x311   : > { %4214 = vpow2.f32 %v1411_v20 }
 0x312   : > { %v1417_v29 = vmul.f32 1.442695, %v1405_v25  ;;  %v1415_v32 = vmul.f32 1.442695, %v1404_v26 }
 0x313   : > { %v1397_v41 = vpop.xlane.xlu0 %1396  ;;  %v1394_v47 = vpop.xlane.xlu1 %1393 }
 0x314   : > { %4216 = vpow2.f32 %v1417_v29  ;;  %v1407_v10 = vsub.f32 %v1296_v24, %v1397_v41  ;;  %v1406_v51 = vsub.f32 %v1220_v23, %v1394_v47 }
 0x315   : > { %4218 = vpow2.f32 %v1415_v32 }
 0x316   : > { %v1421_v1 = vmul.f32 1.442695, %v1407_v10  ;;  %v1419_v2 = vmul.f32 1.442695, %v1406_v51 }
 0x317   : > { %v1400_v4 = vpop.xlane.xlu1 %1399 }
 0x318   : > { %4220 = vpow2.f32 %v1421_v1  ;;  %v1408_v3 = vsub.f32 %v1372_v37, %v1400_v4 }
 0x319   : > { %v4211_v5 = vpop.eup %4210  ;;  %4222 = vpow2.f32 %v1419_v2 }
 0x31a   : > { %v1423_v6 = vmul.f32 1.442695, %v1408_v3  ;;  %v1425_v18 = vsel %vm1376_vm3, %v4211_v5, 0.0 }
 0x31b   : > { %1426 = vadd.xlane.f32.xlu0 %v1425_v18 }
 0x31c   : > { %4224 = vpow2.f32 %v1423_v6 }
 0x31d   : > { %v4213_v9 = vpop.eup %4212 }
 0x31e   : > { %v4215_v8 = vpop.eup %4214  ;;  %v1431_v11 = vsel %vm1376_vm3, %v4213_v9, 0.0 }
 0x31f   : > { %1432 = vadd.xlane.f32.xlu0 %v1431_v11  ;;  %v1428_v23 = vsel %vm1376_vm3, %v4215_v8, 0.0 }
 0x320   : > { %1429 = vadd.xlane.f32.xlu1 %v1428_v23 }
 0x321   : > { %v4703_v24 = vpop.eup %4216 }
 0x322   : > { %v4705_v19 = vpop.eup %4218  ;;  %v1437_v37 = vsel %vm1376_vm3, %v4703_v24, 0.0 }
 0x323   : > { %1438 = vadd.xlane.f32.xlu0 %v1437_v37  ;;  %v1434_v20 = vsel %vm1376_vm3, %v4705_v19, 0.0 }
 0x324   : > { %1435 = vadd.xlane.f32.xlu1 %v1434_v20 }
 0x325   : > { %v4711_v21 = vpop.eup %4220 }
 0x326   : > { %v4713_v22 = vpop.eup %4222  ;;  %v1443_v25 = vsel %vm1376_vm3, %v4711_v21, 0.0 }
 0x327   : > { %1444 = vadd.xlane.f32.xlu0 %v1443_v25  ;;  %v1440_v26 = vsel %vm1376_vm3, %v4713_v22, 0.0 }
 0x328   : > { %1441 = vadd.xlane.f32.xlu1 %v1440_v26 }
 0x329   : > { %v4719_v29 = vpop.eup %4224 }
 0x32a   : > { %v1446_v32 = vsel %vm1376_vm3, %v4719_v29, 0.0 }
 0x32c   : > { %1447 = vadd.xlane.f32.xlu1 %v1446_v32 }
 0x3a4   : > { %v1427_v41 = vpop.xlane.xlu0 %1426 }
 0x3a5   : > { %4226 = vrcp.f32 %v1427_v41 }
 0x3a8   : > { %v1433_v47 = vpop.xlane.xlu0 %1432 }
 0x3a9   : > { %4228 = vrcp.f32 %v1433_v47  ;;  %v1430_v10 = vpop.xlane.xlu1 %1429 }
 0x3aa   : > { %4230 = vrcp.f32 %v1430_v10 }
 0x3ac   : > { %v1439_v51 = vpop.xlane.xlu0 %1438 }
 0x3ad   : > { %4232 = vrcp.f32 %v1439_v51  ;;  %v1436_v1 = vpop.xlane.xlu1 %1435 }
 0x3ae   : > { %4234 = vrcp.f32 %v1436_v1 }
 0x3b0   : > { %v1445_v2 = vpop.xlane.xlu0 %1444 }
 0x3b1   : > { %4236 = vrcp.f32 %v1445_v2  ;;  %v1442_v4 = vpop.xlane.xlu1 %1441 }
 0x3b2   : > { %v4227_v3 = vpop.eup %4226  ;;  %4238 = vrcp.f32 %v1442_v4 }
 0x3b3   : > { %v1457_v6 = vmul.f32 %v4227_v3, %v1427_v41 }
 0x3b5   : > { %v1465_v18 = vsub.f32 2.0, %v1457_v6  ;;  %v1448_v11 = vpop.xlane.xlu1 %1447 }
 0x3b6   : > { %v4229_v23 = vpop.eup %4228  ;;  %4240 = vrcp.f32 %v1448_v11 }
 0x3b7   : > { %v4231_v37 = vpop.eup %4230  ;;  %v1473_v20 = vmul.f32 %v4227_v3, %v1465_v18  ;;  %v1459_v25 = vmul.f32 %v4229_v23, %v1433_v47 }
 0x3b8   : > { %v1458_v26 = vmul.f32 %v4231_v37, %v1430_v10 }
 0x3b9   : > { %v1481_v32 = vmul.f32 %v4211_v5, %v1473_v20  ;;  %v1467_v63 = vsub.f32 2.0, %v1459_v25 }
 0x3ba   : > { %v4233_v0 = vpop.eup %4232  ;;  %v1466_v57 = vsub.f32 2.0, %v1458_v26 }
 0x3bb   : > { %v4235_v59 = vpop.eup %4234  ;;  %v1475_v60 = vmul.f32 %v4229_v23, %v1467_v63  ;;  %v1461_v62 = vmul.f32 %v4233_v0, %v1439_v51  ;;  %4040 = vmatmul.mubr.msk.f32.vlgmr.msra.gmra.mxu1 %vm1376_vm3, %v1481_v32 }
 0x3bc   : > { %v1474_v48 = vmul.f32 %v4231_v37, %v1466_v57  ;;  %v1460_v50 = vmul.f32 %v4235_v59, %v1436_v1  ;;  %4048 = vmatpush3.msra.mxu1 %v4502_v12  ;;  %4049 = vmatprep.mubr.msk.f32.mxu1 %vm4367_vm2, %v4366_v7 }
 0x3bd   : > { %v1483_v41 = vmul.f32 %v4213_v9, %v1475_v60  ;;  %v1469_v3 = vsub.f32 2.0, %v1461_v62  ;;  %4057 = vmatprep.subr.mxu1 %v4366_v7 }
 0x3be   : > { %v4237_v5 = vpop.eup %4236  ;;  %v1482_v47 = vmul.f32 %v4215_v8, %v1474_v48  ;;  %v1468_v10 = vsub.f32 2.0, %v1460_v50 }
 0x3bf   : > { %v4239_v6 = vpop.eup %4238  ;;  %v1477_v18 = vmul.f32 %v4233_v0, %v1469_v3  ;;  %v1463_v63 = vmul.f32 %v4237_v5, %v1445_v2  ;;  %4050 = vmatmul.mubr.msk.f32.vlgmr.msra.gmra.mxu1 %vm1376_vm3, %v1483_v41 }
 0x3c0   : > { %v1476_v51 = vmul.f32 %v4235_v59, %v1468_v10  ;;  %v1462_v57 = vmul.f32 %v4239_v6, %v1442_v4  ;;  %4045 = vmatmul.mubr.msk.f32.vlgmr.msra.gmra.mxu0 %vm1376_vm3, %v1482_v47  ;;  %4058 = vmatpush3.msra.mxu1 %v4510_v14 }
 0x3c1   : > { %v1485_v12 = vmul.f32 %v4703_v24, %v1477_v18  ;;  %v1471_v60 = vsub.f32 2.0, %v1463_v63  ;;  %4053 = vmatpush3.msra.mxu0 %v4508_v13  ;;  %4054 = vmatprep.mubr.msk.f32.mxu0 %vm4367_vm2, %v4366_v7 }
 0x3c2   : > { %v1484_v48 = vmul.f32 %v4705_v19, %v1476_v51  ;;  %v1470_v50 = vsub.f32 2.0, %v1462_v57  ;;  %4059 = vmatprep.mubr.msk.f32.mxu1 %vm4367_vm2, %v4366_v7  ;;  %4067 = vmatprep.subr.mxu1 %v4366_v7 }
 0x3c3   : > { %v4241_v59 = vpop.eup %4240  ;;  %v1479_v62 = vmul.f32 %v4237_v5, %v1471_v60  ;;  %4060 = vmatmul.mubr.msk.f32.vlgmr.msra.gmra.mxu1 %vm1376_vm3, %v1485_v12  ;;  %4062 = vmatprep.subr.mxu0 %v4366_v7 }
 0x3c4   : > { %v1478_v14 = vmul.f32 %v4239_v6, %v1470_v50  ;;  %v1464_v0 = vmul.f32 %v4241_v59, %v1448_v11  ;;  %4055 = vmatmul.mubr.msk.f32.vlgmr.msra.gmra.mxu0 %vm1376_vm3, %v1484_v48  ;;  %4068 = vmatpush3.msra.mxu1 %v4518_v16 }
 0x3c5   : > { %v1487_v13 = vmul.f32 %v4711_v21, %v1479_v62  ;;  %4063 = vmatpush3.msra.mxu0 %v4516_v15  ;;  %4064 = vmatprep.mubr.msk.f32.mxu0 %vm4367_vm2, %v4366_v7 }
 0x3c6   : > { %v1486_v9 = vmul.f32 %v4713_v22, %v1478_v14  ;;  %v1472_v8 = vsub.f32 2.0, %v1464_v0  ;;  %4069 = vmatprep.mubr.msk.f32.mxu1 %vm4367_vm2, %v4366_v7  ;;  %4077 = vmatprep.subr.mxu1 %v4366_v7 }
 0x3c7   : > { %4070 = vmatmul.mubr.msk.f32.vlgmr.msra.gmra.mxu1 %vm1376_vm3, %v1487_v13  ;;  %4072 = vmatprep.subr.mxu0 %v4366_v7 }
 0x3c8   : > { %v1480_v16 = vmul.f32 %v4241_v59, %v1472_v8  ;;  %4065 = vmatmul.mubr.msk.f32.vlgmr.msra.gmra.mxu0 %vm1376_vm3, %v1486_v9  ;;  %4078 = vmatpush3.xpose.msk.msra.mxu1 %vm558_vm1, %v752_v35  ;;  %v5387_v35 = vmax.f32 %v4640_v58, 0.0 }
 0x3c9   : > { %4073 = vmatpush3.msra.mxu0 %v4524_v17  ;;  %4074 = vmatprep.mubr.msk.f32.mxu0 %vm4367_vm2, %v4366_v7  ;;  %v5380_v17 = vmax.f32 %v4593_v42, 0.0 }
 0x3ca   : > { %v1488_v15 = vmul.f32 %v4719_v29, %v1480_v16  ;;  %4079 = vmatprep.mubr.msk.f32.mxu1 %vm4367_vm2, %v4366_v7  ;;  %4082 = vmatprep.subr.mxu0 %v4366_v7 }
 0x3cb   : > { %4087 = vmatprep.subr.mxu1 %v4366_v7  ;;  %4080 = vmatmul.mubr.msk.f32.vlgmr.msra.gmra.mxu1 %vm558_vm1, %v760_v31  ;;  %v5384_v31 = vmax.f32 %v4621_v52, 0.0 }
 0x3cc   : > { %4075 = vmatmul.mubr.msk.f32.vlgmr.msra.gmra.mxu0 %vm1376_vm3, %v1488_v15  ;;  %4088 = vmatpush3.xpose.msk.msra.mxu1 %vm558_vm1, %v754_v45 }
 0x3cd   : > { %4083 = vmatpush3.xpose.msk.msra.mxu0 %vm558_vm1, %v753_v43  ;;  %4084 = vmatprep.mubr.msk.f32.mxu0 %vm4367_vm2, %v4366_v7 }
 0x3ce   : > { %4089 = vmatprep.mubr.msk.f32.mxu1 %vm4367_vm2, %v4366_v7  ;;  %4092 = vmatprep.subr.mxu0 %v4366_v7 }
 0x3cf   : > { %4097 = vmatprep.subr.mxu1 %v4366_v7  ;;  %4090 = vmatmul.mubr.msk.f32.vlgmr.msra.gmra.mxu1 %vm558_vm1, %v762_v40 }
 0x3d0   : > { %4085 = vmatmul.mubr.msk.f32.vlgmr.msra.gmra.mxu0 %vm558_vm1, %v761_v38  ;;  %4098 = vmatpush3.xpose.msk.msra.mxu1 %vm558_vm1, %v756_v55 }
 0x3d1   : > { %4093 = vmatpush3.xpose.msk.msra.mxu0 %vm558_vm1, %v755_v53  ;;  %4094 = vmatprep.mubr.msk.f32.mxu0 %vm4367_vm2, %v4366_v7 }
 0x3d2   : > { %4099 = vmatprep.mubr.msk.f32.mxu1 %vm4367_vm2, %v4366_v7  ;;  %4102 = vmatprep.subr.mxu0 %v4366_v7 }
 0x3d3   : > { %4107 = vmatprep.subr.mxu1 %v4366_v7  ;;  %4100 = vmatmul.mubr.msk.f32.vlgmr.msra.gmra.mxu1 %vm558_vm1, %v5380_v17 }
 0x3d4   : > { %4095 = vmatmul.mubr.msk.f32.vlgmr.msra.gmra.mxu0 %vm558_vm1, %v5381_v27  ;;  %4108 = vmatpush3.xpose.msk.msra.mxu1 %vm558_vm1, %v5382_v28 }
 0x3d5   : > { %4103 = vmatpush3.xpose.msk.msra.mxu0 %vm558_vm1, %v5383_v30  ;;  %4104 = vmatprep.mubr.msk.f32.mxu0 %vm4367_vm2, %v4366_v7 }
 0x3d6   : > { %4109 = vmatprep.mubr.msk.f32.mxu1 %vm4367_vm2, %v4366_v7  ;;  %4112 = vmatprep.subr.mxu0 %v4366_v7 }
 0x3d7   : > { %4110 = vmatmul.mubr.msk.f32.vlgmr.msra.gmra.mxu1 %vm558_vm1, %v5384_v31  ;;  %4117 = vmatprep.subr.mxu1 %v4366_v7 }
 0x3d8   : > { %4105 = vmatmul.mubr.msk.f32.vlgmr.msra.gmra.mxu0 %vm558_vm1, %v5385_v33  ;;  %4119 = vmatprep.mubr.msk.f32.mxu1 %vm4367_vm2, %v4366_v7 }
 0x3d9   : > { %4113 = vmatpush3.xpose.msk.msra.mxu0 %vm558_vm1, %v5386_v34  ;;  %4114 = vmatprep.mubr.msk.f32.mxu0 %vm4367_vm2, %v4366_v7 }
 0x3da   : > { %4122 = vmatprep.subr.mxu0 %v4366_v7 }
 0x3dc   : > { %4115 = vmatmul.mubr.msk.f32.vlgmr.msra.gmra.mxu0 %vm558_vm1, %v5387_v35  ;;  %vm5366_vm1 = vcmask 786053  }
 0x3dd   : > { %4124 = vmatprep.mubr.msk.f32.mxu0 %vm4367_vm2, %v4366_v7 }
 0x47b   : > { %v4836_v36 = vpop.f32.mrf.mxu1 }
 0x47d   : > { %v4041_v38 = vpop.f32.mrf.mxu1 }
 0x47f   : > { %v1704_v39 = vpop.f32.mrf.mxu1 }
 0x480   : > { %v1631_v40 = vpop.f32.mrf.mxu0  ;;  %v4838_v42 = vrot.slane %v1704_v39, 6 }
 0x481   : > { %v4840_v43 = vrot.slane %v1631_v40, 7  ;;  %v4051_v44 = vpop.f32.mrf.mxu1 }
 0x482   : > { %v4046_v45 = vpop.f32.mrf.mxu0 }
 0x483   : > { %v1850_v46 = vpop.f32.mrf.mxu1  ;;  %v2104_v49 = vsel %vm2085_vm4, %v4840_v43, %v4836_v36  ;;  %v2120_v52 = vsel %vm2088_vm5, %v4840_v43, %v4836_v36  ;;  %v2136_v53 = vsel %vm2091_vm6, %v4840_v43, %v4836_v36  ;;  %v2152_v54 = vsel %vm2094_vm7, %v4840_v43, %v4836_v36 }
 0x484   : > { %v1777_v55 = vpop.f32.mrf.mxu0  ;;  %v2090_v56 = vrot.slane %v1850_v46, 4  ;;  %v2105_v58 = vsel %vm2088_vm5, %v4838_v42, %v2104_v49  ;;  %v2121_v61 = vsel %vm2091_vm6, %v4838_v42, %v2120_v52  ;;  %v2137_v24 = vsel %vm2094_vm7, %v4838_v42, %v2136_v53 }
 0x485   : > { %v2087_v19 = vrot.slane %v1777_v55, 5  ;;  %v4061_v21 = vpop.f32.mrf.mxu1  ;;  %v2153_v22 = vsel %vm2097_vm8, %v4838_v42, %v2152_v54  ;;  %v2168_v29 = vsel %vm2097_vm8, %v4840_v43, %v4836_v36  ;;  %v2200_v4 = vsel %vm2082_vm10, %v4838_v42, %v4840_v43 }
 0x486   : > { %v4056_v1 = vpop.f32.mrf.mxu0  ;;  %v4867_v2 = vsel %vm2100_vm9, %v4838_v42, %v2168_v29  ;;  %v2083_v60 = vsel %vm2082_vm10, %v4840_v43, %v4836_v36 }
 0x487   : > { %v1996_v11 = vpop.f32.mrf.mxu1  ;;  %v2106_v23 = vsel %vm2091_vm6, %v2087_v19, %v2105_v58  ;;  %v2122_v37 = vsel %vm2094_vm7, %v2087_v19, %v2121_v61  ;;  %v2138_v20 = vsel %vm2097_vm8, %v2087_v19, %v2137_v24  ;;  %v4876_v25 = vsel %vm2100_vm9, %v2087_v19, %v2153_v22 }
 0x488   : > { %v1923_v26 = vpop.f32.mrf.mxu0  ;;  %v4878_v32 = vrot.slane %v1996_v11, 2  ;;  %v2107_v41 = vsel %vm2094_vm7, %v2090_v56, %v2106_v23  ;;  %v2123_v3 = vsel %vm2097_vm8, %v2090_v56, %v2122_v37  ;;  %v4883_v5 = vsel %vm2100_vm9, %v2090_v56, %v2138_v20 }
 0x489   : > { %v2093_v47 = vrot.slane %v1923_v26, 3  ;;  %v4071_v10 = vpop.f32.mrf.mxu1  ;;  %v2170_v6 = vsel %vm2082_vm10, %v2090_v56, %v2087_v19  ;;  %v2185_v18 = vsel %vm2082_vm10, %v2087_v19, %v4838_v42  ;;  %v2201_v63 = vsel %vm2085_vm4, %v2087_v19, %v2200_v4 }
 0x48a   : > { %v4066_v51 = vpop.f32.mrf.mxu0  ;;  %v2186_v57 = vsel %vm2085_vm4, %v2090_v56, %v2185_v18  ;;  %v2202_v12 = vsel %vm2088_vm5, %v2090_v56, %v2201_v63  ;;  %v2086_v30 = vsel %vm2085_vm4, %v4838_v42, %v2083_v60 }
 0x48b   : > { %v2290_v48 = vpop.f32.mrf.mxu1  ;;  %v2108_v50 = vsel %vm2097_vm8, %v2093_v47, %v2107_v41  ;;  %v4896_v59 = vsel %vm2100_vm9, %v2093_v47, %v2123_v3  ;;  %v4900_v62 = vsel %vm2082_vm10, %v4878_v32, %v2093_v47  ;;  %v2155_v14 = vsel %vm2082_vm10, %v2093_v47, %v2090_v56 }
 0x48c   : > { %v2069_v0 = vpop.f32.mrf.mxu0  ;;  %v2784_v13 = vsel %vm1376_vm3, %v2290_v48, -inf  ;;  %v4909_v9 = vsel %vm2100_vm9, %v4878_v32, %v2108_v50  ;;  %v4913_v8 = vsel %vm2085_vm4, %v4878_v32, %v2155_v14  ;;  %v2171_v16 = vsel %vm2085_vm4, %v2093_v47, %v2170_v6 }
 0x48d   : > { %2785 = vmax.xlane.f32.xlu0 %v2784_v13  ;;  %v4081_v15 = vpop.f32.mrf.mxu1  ;;  %v4918_v17 = vsel %vm2088_vm5, %v4878_v32, %v2171_v16  ;;  %v2187_v27 = vsel %vm2088_vm5, %v2093_v47, %v2186_v57  ;;  %v2203_v28 = vsel %vm2091_vm6, %v2093_v47, %v2202_v12  ;;  %v2089_v35 = vsel %vm2088_vm5, %v2087_v19, %v2086_v30 }
 0x48e   : > { %v4076_v31 = vpop.f32.mrf.mxu0  ;;  %v4926_v33 = vsel %vm2091_vm6, %v4878_v32, %v2187_v27  ;;  %v4930_v34 = vsel %vm2094_vm7, %v4878_v32, %v2203_v28  ;;  %v4934_v38 = vrot.slane %v2069_v0, 1  ;;  %v2092_v42 = vsel %vm2091_vm6, %v2090_v56, %v2089_v35 }
 0x48f   : > { %v2430_v39 = vpop.f32.mrf.mxu1  ;;  %v2095_v49 = vsel %vm2094_vm7, %v2093_v47, %v2092_v42 }
 0x490   : > { %v2360_v40 = vpop.f32.mrf.mxu0  ;;  %v2790_v44 = vsel %vm1376_vm3, %v2430_v39, -inf  ;;  %v2098_v53 = vsel %vm2097_vm8, %v4878_v32, %v2095_v49 }
 0x491   : > { %2791 = vmax.xlane.f32.xlu0 %v2790_v44  ;;  %v4091_v45 = vpop.f32.mrf.mxu1  ;;  %v2787_v46 = vsel %vm1376_vm3, %v2360_v40, -inf  ;;  %v2101_v55 = vsel %vm2100_vm9, %v4934_v38, %v2098_v53 }
 0x492   : > { %2788 = vmax.xlane.f32.xlu1 %v2787_v46  ;;  %v4086_v52 = vpop.f32.mrf.mxu0  ;;  %2103 = vst.msk [vmem:[%s4947_s9] sm:$0xff] %vm342_vm0, %v2101_v55 }
 0x493   : > { %v2570_v54 = vpop.f32.mrf.mxu1 }
 0x494   : > { %v2500_v58 = vpop.f32.mrf.mxu0  ;;  %v2796_v61 = vsel %vm1376_vm3, %v2570_v54, -inf }
 0x495   : > { %2797 = vmax.xlane.f32.xlu0 %v2796_v61  ;;  %v4101_v56 = vpop.f32.mrf.mxu1  ;;  %v2793_v24 = vsel %vm1376_vm3, %v2500_v58, -inf }
 0x496   : > { %2794 = vmax.xlane.f32.xlu1 %v2793_v24  ;;  %v4096_v19 = vpop.f32.mrf.mxu0 }
 0x497   : > { %v2710_v21 = vpop.f32.mrf.mxu1 }
 0x498   : > { %v2640_v22 = vpop.f32.mrf.mxu0  ;;  %v2802_v29 = vsel %vm1376_vm3, %v2710_v21, -inf }
 0x499   : > { %2803 = vmax.xlane.f32.xlu0 %v2802_v29  ;;  %v4111_v1 = vpop.f32.mrf.mxu1  ;;  %v2799_v4 = vsel %vm1376_vm3, %v2640_v22, -inf }
 0x49a   : > { %2800 = vmax.xlane.f32.xlu1 %v2799_v4  ;;  %v4106_v11 = vpop.f32.mrf.mxu0 }
 0x49c   : > { %v2780_v23 = vpop.f32.mrf.mxu0 }
 0x49d   : > { %v2805_v37 = vsel %vm1376_vm3, %v2780_v23, -inf }
 0x49e   : > { %2806 = vmax.xlane.f32.xlu1 %v2805_v37  ;;  %v4116_v20 = vpop.f32.mrf.mxu0 }
 0x516   : > { %v2786_v26 = vpop.xlane.xlu0 %2785 }
 0x517   : > { %v2808_v41 = vsub.f32 %v2290_v48, %v2786_v26 }
 0x519   : > { %v2816_v3 = vmul.f32 1.442695, %v2808_v41 }
 0x51a   : > { %v2792_v47 = vpop.xlane.xlu0 %2791 }
 0x51b   : > { %4242 = vpow2.f32 %v2816_v3  ;;  %v2810_v10 = vsub.f32 %v2430_v39, %v2792_v47  ;;  %v2789_v6 = vpop.xlane.xlu1 %2788 }
 0x51c   : > { %v2809_v18 = vsub.f32 %v2360_v40, %v2789_v6 }
 0x51d   : > { %v2820_v63 = vmul.f32 1.442695, %v2810_v10 }
 0x51e   : > { %v2818_v51 = vmul.f32 1.442695, %v2809_v18  ;;  %v2798_v57 = vpop.xlane.xlu0 %2797 }
 0x51f   : > { %4244 = vpow2.f32 %v2820_v63  ;;  %v2812_v12 = vsub.f32 %v2570_v54, %v2798_v57  ;;  %v2795_v60 = vpop.xlane.xlu1 %2794  ;;  %v2218_v63 = vld [vmem:[%s4475_s21 + $0x10] sm:$0xff] }
 0x520   : > { %4246 = vpow2.f32 %v2818_v51  ;;  %v2811_v50 = vsub.f32 %v2500_v58, %v2795_v60 }
 0x521   : > { %v2824_v14 = vmul.f32 1.442695, %v2812_v12 }
 0x522   : > { %v2822_v0 = vmul.f32 1.442695, %v2811_v50  ;;  %v2804_v13 = vpop.xlane.xlu0 %2803 }
 0x523   : > { %4248 = vpow2.f32 %v2824_v14  ;;  %v2814_v16 = vsub.f32 %v2710_v21, %v2804_v13  ;;  %v2801_v48 = vpop.xlane.xlu1 %2800  ;;  %v2216_v21 = vld [vmem:[%s4475_s21] sm:$0xff] }
 0x524   : > { %4250 = vpow2.f32 %v2822_v0  ;;  %v2813_v15 = vsub.f32 %v2640_v22, %v2801_v48  ;;  %4118 = vmatpush3.msra.mxu1 %v2216_v21  ;;  %v2125_v22 = vsel %vm2082_vm10, %v4934_v38, %v4878_v32  ;;  %v2157_v32 = vsel %vm2088_vm5, %v4934_v38, %v4913_v8 }
 0x525   : > { %v2828_v27 = vmul.f32 1.442695, %v2814_v16  ;;  %4127 = vmatprep.subr.mxu1 %v4366_v7 }
 0x526   : > { %v2826_v28 = vmul.f32 1.442695, %v2813_v15 }
 0x527   : > { %4252 = vpow2.f32 %v2828_v27  ;;  %v2807_v30 = vpop.xlane.xlu1 %2806  ;;  %v2220_v27 = vld [vmem:[%s4475_s21 + $0x20] sm:$0xff] }
 0x528   : > { %v4955_v31 = vpop.eup %4242  ;;  %4254 = vpow2.f32 %v2826_v28  ;;  %v2815_v35 = vsub.f32 %v2780_v23, %v2807_v30 }
 0x529   : > { %v2832_v39 = vsel %vm1376_vm3, %v4955_v31, 0.0 }
 0x52a   : > { %v2830_v40 = vmul.f32 1.442695, %v2815_v35  ;;  %2833 = vadd.xlane.f32.xlu0 %v2832_v39  ;;  %v2219_v35 = vld [vmem:[%s4475_s21 + $0x18] sm:$0xff] }
 0x52c   : > { %v4959_v44 = vpop.eup %4244  ;;  %4256 = vpow2.f32 %v2830_v40 }
 0x52d   : > { %v4961_v42 = vpop.eup %4246  ;;  %v2838_v45 = vsel %vm1376_vm3, %v4959_v44, 0.0 }
 0x52e   : > { %2839 = vadd.xlane.f32.xlu0 %v2838_v45  ;;  %v2835_v46 = vsel %vm1376_vm3, %v4961_v42, 0.0 }
 0x52f   : > { %2836 = vadd.xlane.f32.xlu1 %v2835_v46 }
 0x530   : > { %v4967_v49 = vpop.eup %4248 }
 0x531   : > { %v4969_v52 = vpop.eup %4250  ;;  %v2844_v53 = vsel %vm1376_vm3, %v4967_v49, 0.0 }
 0x532   : > { %2845 = vadd.xlane.f32.xlu0 %v2844_v53  ;;  %v2841_v54 = vsel %vm1376_vm3, %v4969_v52, 0.0 }
 0x533   : > { %2842 = vadd.xlane.f32.xlu1 %v2841_v54 }
 0x534   : > { %v4975_v55 = vpop.eup %4252 }
 0x535   : > { %v4977_v58 = vpop.eup %4254  ;;  %v2850_v61 = vsel %vm1376_vm3, %v4975_v55, 0.0 }
 0x536   : > { %2851 = vadd.xlane.f32.xlu0 %v2850_v61  ;;  %v2847_v56 = vsel %vm1376_vm3, %v4977_v58, 0.0 }
 0x537   : > { %2848 = vadd.xlane.f32.xlu1 %v2847_v56  ;;  %v2222_v56 = vld [vmem:[%s4475_s21 + $0x30] sm:$0xff] }
 0x539   : > { %v4983_v24 = vpop.eup %4256 }
 0x53a   : > { %v2853_v19 = vsel %vm1376_vm3, %v4983_v24, 0.0 }
 0x53b   : > { %2854 = vadd.xlane.f32.xlu1 %v2853_v19 }
 0x54c   : > { %2112 = vrot.lane.b32.xlu1 %v4934_v38, %s4368_s13  ;;  %2110 = vrot.lane.b32.xlu0 %v4909_v9, %s4368_s13  ;;  %v2217_v9 = vld [vmem:[%s4475_s21 + $0x8] sm:$0xff] }
 0x54d   : > { %4123 = vmatpush3.msra.mxu0 %v2217_v9 }
 0x54e   : > { %4132 = vmatprep.subr.mxu0 %v4366_v7 }
 0x550   : > { %2126 = vrot.lane.b32.xlu1 %v4896_v59, %s4369_s14  ;;  %2142 = vrot.lane.b32.xlu0 %v4883_v5, %s5377_s15  ;;  %v2141_v5 = vsel %vm2085_vm4, %v4934_v38, %v4900_v62  ;;  %v2173_v59 = vsel %vm2091_vm6, %v4934_v38, %v4918_v17 }
 0x554   : > { %2128 = vrot.lane.b32.xlu1 %v2125_v22, %s4369_s14  ;;  %2158 = vrot.lane.b32.xlu0 %v4876_v25, %s4371_s16  ;;  %v2184_v25 = vsel %vm2100_vm9, %v4840_v43, %v4836_v36  ;;  %v2205_v43 = vsel %vm2097_vm8, %v4934_v38, %v4930_v34 }
 0x558   : > { %2144 = vrot.lane.b32.xlu1 %v2141_v5, %s5377_s15  ;;  %2174 = vrot.lane.b32.xlu0 %v4867_v2, %s5375_s17  ;;  %v2189_v2 = vsel %vm2094_vm7, %v4934_v38, %v4926_v33 }
 0x55c   : > { %2160 = vrot.lane.b32.xlu1 %v2157_v32, %s4371_s16  ;;  %2190 = vrot.lane.b32.xlu0 %v2184_v25, %s5372_s18 }
 0x560   : > { %2176 = vrot.lane.b32.xlu1 %v2173_v59, %s5375_s17  ;;  %2206 = vrot.lane.b32.xlu0 %v4836_v36, %s5373_s19 }
 0x564   : > { %2192 = vrot.lane.b32.xlu1 %v2189_v2, %s5372_s18 }
 0x568   : > { %2208 = vrot.lane.b32.xlu1 %v2205_v43, %s5373_s19  ;;  %s4375_s19 = smov [#allocation2]  }
 0x5b3   : > { %v2834_v62 = vpop.xlane.xlu0 %2833 }
 0x5b4   : > { %4258 = vrcp.f32 %v2834_v62 }
 0x5b7   : > { %v2840_v8 = vpop.xlane.xlu0 %2839 }
 0x5b8   : > { %4260 = vrcp.f32 %v2840_v8  ;;  %v2837_v17 = vpop.xlane.xlu1 %2836 }
 0x5b9   : > { %4262 = vrcp.f32 %v2837_v17 }
 0x5bb   : > { %v2846_v36 = vpop.xlane.xlu0 %2845 }
 0x5bc   : > { %4264 = vrcp.f32 %v2846_v36  ;;  %v2843_v29 = vpop.xlane.xlu1 %2842 }
 0x5bd   : > { %4266 = vrcp.f32 %v2843_v29 }
 0x5bf   : > { %v2852_v33 = vpop.xlane.xlu0 %2851 }
 0x5c0   : > { %4268 = vrcp.f32 %v2852_v33  ;;  %v2849_v1 = vpop.xlane.xlu1 %2848 }
 0x5c1   : > { %v4259_v4 = vpop.eup %4258  ;;  %4270 = vrcp.f32 %v2849_v1 }
 0x5c2   : > { %v2864_v34 = vmul.f32 %v4259_v4, %v2834_v62 }
 0x5c3   : > { %v2111_v38 = vpop.permute.xlu0 %2110 }
 0x5c4   : > { %v2872_v11 = vsub.f32 2.0, %v2864_v34  ;;  %2117 = vst.msk [vmem:[%s4947_s9 - $0x1] sm:$0xfe] %vm5364_vm11, %v2111_v38  ;;  %v5035_v23 = vpop.xlane.xlu1 %2854  ;;  %vm5367_vm11 = vcmask 386304  }
 0x5c5   : > { %v4261_v37 = vpop.eup %4260  ;;  %4272 = vrcp.f32 %v5035_v23 }
 0x5c6   : > { %v4263_v20 = vpop.eup %4262  ;;  %v2880_v26 = vmul.f32 %v4259_v4, %v2872_v11  ;;  %v2866_v41 = vmul.f32 %v4261_v37, %v2840_v8 }
 0x5c7   : > { %v2865_v3 = vmul.f32 %v4263_v20, %v2837_v17  ;;  %v2143_v47 = vpop.permute.xlu0 %2142 }
 0x5c8   : > { %v2888_v10 = vmul.f32 %v4955_v31, %v2880_v26  ;;  %v2874_v6 = vsub.f32 2.0, %v2866_v41  ;;  %v2113_v18 = vpop.permute.xlu1 %2112 }
 0x5c9   : > { %v4265_v51 = vpop.eup %4264  ;;  %v2873_v57 = vsub.f32 2.0, %v2865_v3  ;;  %2119 = vst.msk [vmem:[%s4947_s9 + $0x7] sm:$0x1] %vm2118_vm12, %v2113_v18 }
 0x5ca   : > { %v4267_v12 = vpop.eup %4266  ;;  %v2882_v60 = vmul.f32 %v4261_v37, %v2874_v6  ;;  %v2868_v50 = vmul.f32 %v4265_v51, %v2846_v36  ;;  %4120 = vmatmul.mubr.msk.f32.vlgmr.msra.gmra.mxu1 %vm1376_vm3, %v2888_v10 }
 0x5cb   : > { %v2881_v14 = vmul.f32 %v4263_v20, %v2873_v57  ;;  %v2867_v0 = vmul.f32 %v4267_v12, %v2843_v29  ;;  %v2159_v13 = vpop.permute.xlu0 %2158  ;;  %4128 = vmatpush3.msra.mxu1 %v2218_v63  ;;  %4129 = vmatprep.mubr.msk.f32.mxu1 %vm4367_vm2, %v4366_v7 }
 0x5cc   : > { %v2890_v16 = vmul.f32 %v4959_v44, %v2882_v60  ;;  %v2876_v48 = vsub.f32 2.0, %v2868_v50  ;;  %v2127_v15 = vpop.permute.xlu1 %2126  ;;  %4137 = vmatprep.subr.mxu1 %v4366_v7 }
 0x5cd   : > { %v4269_v28 = vpop.eup %4268  ;;  %v2889_v30 = vmul.f32 %v4961_v42, %v2881_v14  ;;  %v2875_v31 = vsub.f32 2.0, %v2867_v0  ;;  %2133 = vst.msk [vmem:[%s4947_s9 - $0x2] sm:$0xfc] %vm2132_vm13, %v2127_v15 }
 0x5ce   : > { %v4271_v39 = vpop.eup %4270  ;;  %v2884_v40 = vmul.f32 %v4265_v51, %v2876_v48  ;;  %v2870_v45 = vmul.f32 %v4269_v28, %v2852_v33  ;;  %2149 = vst.msk [vmem:[%s4947_s9 - $0x3] sm:$0xf8] %vm5370_vm14, %v2143_v47  ;;  %4130 = vmatmul.mubr.msk.f32.vlgmr.msra.gmra.mxu1 %vm1376_vm3, %v2890_v16  ;;  %vm2198_vm14 = vcmask 915200  }
 0x5cf   : > { %v2883_v44 = vmul.f32 %v4267_v12, %v2875_v31  ;;  %v2869_v46 = vmul.f32 %v4271_v39, %v2849_v1  ;;  %4125 = vmatmul.mubr.msk.f32.vlgmr.msra.gmra.mxu0 %vm1376_vm3, %v2889_v30  ;;  %v2175_v42 = vpop.permute.xlu0 %2174  ;;  %2165 = vst.msk [vmem:[%s4947_s9 - $0x4] sm:$0xf0] %vm5365_vm15, %v2159_v13  ;;  %4138 = vmatpush3.msra.mxu1 %v2220_v27  ;;  %vm5368_vm15 = vcmask 917254  }
 0x5d0   : > { %v2892_v53 = vmul.f32 %v4967_v49, %v2884_v40  ;;  %v2878_v54 = vsub.f32 2.0, %v2870_v45  ;;  %2181 = vst.msk [vmem:[%s4947_s9 - $0x5] sm:$0xe0] %vm5366_vm1, %v2175_v42  ;;  %v2129_v61 = vpop.permute.xlu1 %2128  ;;  %4133 = vmatpush3.msra.mxu0 %v2219_v35  ;;  %4134 = vmatprep.mubr.msk.f32.mxu0 %vm4367_vm2, %v4366_v7  ;;  %v2221_v49 = vld [vmem:[%s4475_s21 + $0x28] sm:$0xff]  ;;  %vm5369_vm1 = vcmask 518528  }
 0x5d1   : > { %v2891_v19 = vmul.f32 %v4969_v52, %v2883_v44  ;;  %v2877_v21 = vsub.f32 2.0, %v2869_v46  ;;  %2135 = vst.msk [vmem:[%s4947_s9 + $0x6] sm:$0x3] %vm5367_vm11, %v2129_v61  ;;  %4139 = vmatprep.mubr.msk.f32.mxu1 %vm4367_vm2, %v4366_v7  ;;  %4142 = vmatprep.subr.mxu0 %v4366_v7  ;;  %vm5371_vm11 = vcmask 1048455  }
 0x5d2   : > { %v4273_v22 = vpop.eup %4272  ;;  %v2886_v9 = vmul.f32 %v4269_v28, %v2878_v54  ;;  %4140 = vmatmul.mubr.msk.f32.vlgmr.msra.gmra.mxu1 %vm1376_vm3, %v2892_v53  ;;  %4147 = vmatprep.subr.mxu1 %v4366_v7 }
 0x5d3   : > { %v2885_v52 = vmul.f32 %v4271_v39, %v2877_v21  ;;  %v2871_v5 = vmul.f32 %v4273_v22, %v5035_v23  ;;  %4135 = vmatmul.mubr.msk.f32.vlgmr.msra.gmra.mxu0 %vm1376_vm3, %v2891_v19  ;;  %v2191_v32 = vpop.permute.xlu0 %2190  ;;  %4148 = vmatpush3.msra.mxu1 %v2222_v56 }
 0x5d4   : > { %v2894_v25 = vmul.f32 %v4975_v55, %v2886_v9  ;;  %2197 = vst.msk [vmem:[%s4947_s9 - $0x6] sm:$0xc0] %vm5368_vm15, %v2191_v32  ;;  %v2145_v59 = vpop.permute.xlu1 %2144  ;;  %4143 = vmatpush3.msra.mxu0 %v2221_v49  ;;  %4144 = vmatprep.mubr.msk.f32.mxu0 %vm4367_vm2, %v4366_v7  ;;  %v2223_v55 = vld [vmem:[%s4475_s21 + $0x38] sm:$0xff]  ;;  %vm2166_vm15 = vcmask 650752   ;;  %s5376_s21 = sshll.u32 %s4438_s28, 7 }
 0x5d5   : > { %v2893_v2 = vmul.f32 %v4977_v58, %v2885_v52  ;;  %v2879_v43 = vsub.f32 2.0, %v2871_v5  ;;  %2151 = vst.msk [vmem:[%s4947_s9 + $0x5] sm:$0x7] %vm5369_vm1, %v2145_v59  ;;  %4149 = vmatprep.mubr.msk.f32.mxu1 %vm4367_vm2, %v4366_v7  ;;  %4152 = vmatprep.subr.mxu0 %v4366_v7  ;;  %vm2182_vm1 = vcmask 782976  }
 0x5d6   : > { %4150 = vmatmul.mubr.msk.f32.vlgmr.msra.gmra.mxu1 %vm1376_vm3, %v2894_v25 }
 0x5d7   : > { %v2887_v62 = vmul.f32 %v4273_v22, %v2879_v43  ;;  %4145 = vmatmul.mubr.msk.f32.vlgmr.msra.gmra.mxu0 %vm1376_vm3, %v2893_v2  ;;  %v2207_v58 = vpop.permute.xlu0 %2206 }
 0x5d8   : > { %2213 = vst.msk [vmem:[%s4947_s9 - $0x7] sm:$0x80] %vm5371_vm11, %v2207_v58  ;;  %v2161_v8 = vpop.permute.xlu1 %2160  ;;  %4153 = vmatpush3.msra.mxu0 %v2223_v55  ;;  %4154 = vmatprep.mubr.msk.f32.mxu0 %vm4367_vm2, %v4366_v7  ;;  %vm2214_vm11 = vcmask 1047424  }
 0x5d9   : > { %v2895_v17 = vmul.f32 %v4983_v24, %v2887_v62  ;;  %2167 = vst.msk [vmem:[%s4947_s9 + $0x4] sm:$0xf] %vm2166_vm15, %v2161_v8 }
 0x5db   : > { %4155 = vmatmul.mubr.msk.f32.vlgmr.msra.gmra.mxu0 %vm1376_vm3, %v2895_v17 }
 0x5dc   : > { %v2177_v36 = vpop.permute.xlu1 %2176 }
 0x5dd   : > { %2183 = vst.msk [vmem:[%s4947_s9 + $0x3] sm:$0x1f] %vm2182_vm1, %v2177_v36 }
 0x5e0   : > { %v2193_v29 = vpop.permute.xlu1 %2192 }
 0x5e1   : > { %2199 = vst.msk [vmem:[%s4947_s9 + $0x2] sm:$0x3f] %vm2198_vm14, %v2193_v29 }
 0x5e4   : > { %v2209_v33 = vpop.permute.xlu1 %2208 }
 0x5e5   : > { %2215 = vst.msk [vmem:[%s4947_s9 + $0x1] sm:$0x7f] %vm2214_vm11, %v2209_v33 }
 0x68a   : > { %v5103_v1 = vpop.f32.mrf.mxu1 }
 0x68c   : > { %v4121_v7 = vpop.f32.mrf.mxu1 }
 0x68e   : > { %v3111_v24 = vpop.f32.mrf.mxu1 }
 0x68f   : > { %v3038_v4 = vpop.f32.mrf.mxu0  ;;  %v5107_v11 = vrot.slane %v3111_v24, 6 }
 0x690   : > { %v5105_v34 = vrot.slane %v3038_v4, 7  ;;  %v4131_v38 = vpop.f32.mrf.mxu1 }
 0x691   : > { %v4126_v23 = vpop.f32.mrf.mxu0 }
 0x692   : > { %v3257_v37 = vpop.f32.mrf.mxu1  ;;  %v3574_v20 = vsel %vm2100_vm9, %v5105_v34, %v5103_v1  ;;  %v3532_v26 = vsel %vm2091_vm6, %v5105_v34, %v5103_v1  ;;  %v3560_v47 = vsel %vm2097_vm8, %v5105_v34, %v5103_v1  ;;  %v3518_v18 = vsel %vm2088_vm5, %v5105_v34, %v5103_v1 }
 0x693   : > { %v5115_v41 = vrot.slane %v3257_v37, 4  ;;  %3580 = vrot.lane.b32.xlu0 %v3574_v20, %s5372_s18  ;;  %v3184_v3 = vpop.f32.mrf.mxu0  ;;  %v3504_v63 = vsel %vm2085_vm4, %v5105_v34, %v5103_v1  ;;  %v3533_v57 = vsel %vm2094_vm7, %v5107_v11, %v3532_v26  ;;  %v3519_v12 = vsel %vm2091_vm6, %v5107_v11, %v3518_v18  ;;  %s3603_s18 = scalar_lea.sflag [#allocation3], %s4904_s29 }
 0x694   : > { %v5121_v10 = vrot.slane %v3184_v3, 5  ;;  %v4141_v6 = vpop.f32.mrf.mxu1  ;;  %v3561_v50 = vsel %vm2100_vm9, %v5107_v11, %v3560_v47  ;;  %v3546_v0 = vsel %vm2094_vm7, %v5105_v34, %v5103_v1  ;;  %v3505_v15 = vsel %vm2088_vm5, %v5107_v11, %v3504_v63 }
 0x695   : > { %v4136_v51 = vpop.f32.mrf.mxu0  ;;  %v3547_v35 = vsel %vm2097_vm8, %v5107_v11, %v3546_v0  ;;  %v3489_v40 = vsel %vm2082_vm10, %v5105_v34, %v5103_v1 }
 0x696   : > { %v3403_v60 = vpop.f32.mrf.mxu1  ;;  %v3534_v14 = vsel %vm2097_vm8, %v5121_v10, %v3533_v57  ;;  %v3520_v13 = vsel %vm2094_vm7, %v5121_v10, %v3519_v12  ;;  %v3506_v30 = vsel %vm2091_vm6, %v5121_v10, %v3505_v15  ;;  %v3548_v45 = vsel %vm2100_vm9, %v5121_v10, %v3547_v35 }
 0x697   : > { %3566 = vrot.lane.b32.xlu0 %v3561_v50, %s5375_s17  ;;  %v3330_v16 = vpop.f32.mrf.mxu0  ;;  %v3535_v48 = vsel %vm2100_vm9, %v5115_v41, %v3534_v14  ;;  %v3521_v39 = vsel %vm2097_vm8, %v5115_v41, %v3520_v13  ;;  %v5163_v46 = vrot.slane %v3403_v60, 2  ;;  %v3507_v53 = vsel %vm2094_vm7, %v5115_v41, %v3506_v30  ;;  %s4278_s17 = sshll.u32 %s4375_s19, 4  ;;  %s4279_s17 = int_to_ptr.vmem [resolvable:$false] %s4278_s17 }
 0x698   : > { %v5147_v27 = vrot.slane %v3330_v16, 3  ;;  %3538 = vrot.lane.b32.xlu1 %v3535_v48, %s5377_s15  ;;  %v4151_v28 = vpop.f32.mrf.mxu1  ;;  %v3491_v56 = vsel %vm2085_vm4, %v5107_v11, %v3489_v40  ;;  %v3562_v59 = vsel %vm2082_vm10, %v5115_v41, %v5121_v10  ;;  %v3575_v62 = vsel %vm2082_vm10, %v5121_v10, %v5107_v11  ;;  %s4280_s22 = scalar_lea.vmem %s4279_s17, 256 }
 0x699   : > { %v4146_v31 = vpop.f32.mrf.mxu0  ;;  %v3493_v21 = vsel %vm2088_vm5, %v5121_v10, %v3491_v56 }
 0x69a   : > { %v3522_v44 = vsel %vm2100_vm9, %v5147_v27, %v3521_v39  ;;  %v3508_v61 = vsel %vm2097_vm8, %v5147_v27, %v3507_v53  ;;  %v3549_v22 = vsel %vm2082_vm10, %v5147_v27, %v5115_v41  ;;  %v3495_v9 = vsel %vm2091_vm6, %v5115_v41, %v3493_v21 }
 0x69b   : > { %3552 = vrot.lane.b32.xlu0 %v3548_v45, %s4371_s16  ;;  %v3476_v42 = vpop.f32.mrf.mxu0  ;;  %v3509_v49 = vsel %vm2100_vm9, %v5163_v46, %v3508_v61  ;;  %v3497_v52 = vsel %vm2094_vm7, %v5147_v27, %v3495_v9  ;;  %v3550_v25 = vsel %vm2085_vm4, %v5163_v46, %v3549_v22  ;;  %v3563_v55 = vsel %vm2085_vm4, %v5147_v27, %v3562_v59 }
 0x69c   : > { %v5168_v54 = vrot.slane %v3476_v42, 1  ;;  %3524 = vrot.lane.b32.xlu1 %v3522_v44, %s4369_s14  ;;  %v3499_v5 = vsel %vm2097_vm8, %v5163_v46, %v3497_v52  ;;  %v3536_v58 = vsel %vm2082_vm10, %v5163_v46, %v5147_v27 }
 0x69d   : > { %v4156_v19 = vpop.f32.mrf.mxu0 }
 0x69e   : > { %v3523_v32 = vsel %vm2082_vm10, %v5168_v54, %v5163_v46  ;;  %v3501_v2 = vsel %vm2100_vm9, %v5168_v54, %v3499_v5  ;;  %v3551_v43 = vsel %vm2088_vm5, %v5168_v54, %v3550_v25 }
 0x69f   : > { %3512 = vrot.lane.b32.xlu0 %v5168_v54, %s4368_s13  ;;  %3503 = vst.msk [vmem:[%s5212_s20] sm:$0xff] %vm342_vm0, %v3501_v2 }
 0x6a0   : > { %3510 = vrot.lane.b32.xlu1 %v3509_v49, %s4368_s13  ;;  %s5221_s13 = scalar_lea.hbm %s5354_s6, %s5376_s21 }
 0x6a3   : > { %3526 = vrot.lane.b32.xlu0 %v3523_v32, %s4369_s14  ;;  %s3621_s14 = sshll.u32 %s4947_s9, 4  ;;  %s3622_s14 = int_to_ptr.vmem [resolvable:$true] %s3621_s14 }
 0x6a4   : > { %3554 = vrot.lane.b32.xlu1 %v3551_v43, %s4371_s16  ;;  %s4274_s8 = scalar_lea.vmem %s3622_s14, 128  ;;  %p4281_p0 = scmp.lt.s32.totalorder %s3622_s14, %s4279_s17 }
 0x6a5   : > { %p4275_p11 = scmp.ne.s32.totalorder %s3622_s14, %s4274_s8  ;;  %p4282_p1 = scmp.lt.s32.totalorder %s4280_s22, %s4274_s8 }
 0x6a7   : > { %p4276_p12 = pnand %p4275_p11, %p4455_p5  ;;  %p4283_p2 = por %p4282_p1, %p4281_p0 }
 0x6a9   : > { %p4277_p13 = pneg %p4276_p12 }
 0x6ab   : > { %p4284_p3 = pnand %p4283_p2, %p4277_p13 }
 0x6ad   : > { %4287 = shalt.err (!%p4284_p3)
}
 0x6ae   : > { %s4288_s9 = scalar_lea.hbm %s5221_s13, 128  ;;  %s4292_s19 = scalar_lea.hbm %s5354_s6, 512 }
 0x6af   : > { %p4289_p4 = scmp.ne.s32.totalorder %s5221_s13, %s4288_s9  ;;  %p4293_p9 = scmp.lt.s32.totalorder %s5221_s13, %s5354_s6 }
 0x6b0   : > { %p4294_p10 = scmp.lt.s32.totalorder %s4292_s19, %s4288_s9 }
 0x6b1   : > { %p4290_p7 = pnand %p4289_p4, %p4455_p5 }
 0x6b2   : > { %p4295_p11 = por %p4294_p10, %p4293_p9 }
 0x6b3   : > { %p4291_p8 = pneg %p4290_p7 }
 0x6b5   : > { %p4296_p12 = pnand %p4295_p11, %p4291_p8 }
 0x6b7   : > { %4299 = shalt.err (!%p4296_p12)
}
 0x6b8   : > { %4157 = dma.vmem_to_hbm [thread:$0]  (%p4455_p5), %s3622_s14, 128, %s5221_s13, %s3603_s18   ;;  %v3537_v8 = vsel %vm2085_vm4, %v5168_v54, %v3536_v58  ;;  %v3564_v17 = vsel %vm2088_vm5, %v5163_v46, %v3563_v55  ;;  %v3576_v36 = vsel %vm2085_vm4, %v5115_v41, %v3575_v62  ;;  %v3588_v29 = vsel %vm2082_vm10, %v5107_v11, %v5105_v34 }
 0x6b9   : > { %s5388_s15 = smov 48   ;;  %v3565_v33 = vsel %vm2091_vm6, %v5168_v54, %v3564_v17  ;;  %v3577_v7 = vsel %vm2088_vm5, %v5147_v27, %v3576_v36  ;;  %v3589_v24 = vsel %vm2085_vm4, %v5121_v10, %v3588_v29  ;;  %s5389_s17 = smov 80   ;;  %vm5392_vm0 = vcmask 261249  }
 0x6ba   : > { %3540 = vrot.lane.b32.xlu0 %v3537_v8, %s5388_s15  ;;  %3568 = vrot.lane.b32.xlu1 %v3565_v33, %s5389_s17  ;;  %v3578_v4 = vsel %vm2091_vm6, %v5163_v46, %v3577_v7  ;;  %v3590_v34 = vsel %vm2088_vm5, %v5115_v41, %v3589_v24  ;;  %s5390_s18 = smov 112   ;;  %s5391_s21 = smov 96   ;;  %vm5393_vm2 = vcmask 523651   ;;  %vm5394_vm3 = vcmask 654852  }
 0x6bb   : > { %v3579_v38 = vsel %vm2094_vm7, %v5168_v54, %v3578_v4  ;;  %v3591_v11 = vsel %vm2091_vm6, %v5147_v27, %v3590_v34  ;;  %vm5395_vm4 = vcmask 386304   ;;  %vm5396_vm5 = vcmask 786053   ;;  %s3634_s13 = sshll.u32 %s5212_s20, 4  ;;  %s5400_s14 = sshll.u32 %s4438_s28, 7  ;;  %s3635_s13 = int_to_ptr.vmem [resolvable:$true] %s3634_s13 }
 0x6bc   : > { %v3592_v23 = vsel %vm2094_vm7, %v5163_v46, %v3591_v11  ;;  %vm5397_vm6 = vcmask 917254   ;;  %vm5398_vm7 = vcmask 518528   ;;  %s5310_s9 = scalar_lea.hbm %s5355_s7, %s5400_s14  ;;  %s3608_s16 = scalar_lea.sflag [#allocation5], %s4904_s29 }
 0x6bd   : > { %v3593_v37 = vsel %vm2097_vm8, %v5168_v54, %v3592_v23  ;;  %vm5399_vm8 = vcmask 1048455   ;;  %s4300_s23 = scalar_lea.vmem %s3635_s13, 128  ;;  %s4376_s19 = smov [#allocation4]  }
 0x6be   : > { %3594 = vrot.lane.b32.xlu0 %v5103_v1, %s5390_s18  ;;  %3582 = vrot.lane.b32.xlu1 %v3579_v38, %s5391_s21  ;;  %p4301_p13 = scmp.ne.s32.totalorder %s3635_s13, %s4300_s23  ;;  %s4304_s15 = sshll.u32 %s4376_s19, 4  ;;  %s4305_s15 = int_to_ptr.vmem [resolvable:$false] %s4304_s15 }
 0x6bf   : > { %s4306_s17 = scalar_lea.vmem %s4305_s15, 256  ;;  %p4307_p2 = scmp.lt.s32.totalorder %s3635_s13, %s4305_s15 }
 0x6c0   : > { %p4302_p0 = pnand %p4301_p13, %p4455_p5  ;;  %p4308_p3 = scmp.lt.s32.totalorder %s4306_s17, %s4300_s23 }
 0x6c2   : > { %3596 = vrot.lane.b32.xlu1 %v3593_v37, %s5390_s18  ;;  %p4303_p1 = pneg %p4302_p0  ;;  %p4309_p4 = por %p4308_p3, %p4307_p2 }
 0x6c4   : > { %p4310_p7 = pnand %p4309_p4, %p4303_p1 }
 0x705   : > { %v3581_v1 = vpop.permute.xlu0 %3580 }
 0x709   : > { %v3567_v20 = vpop.permute.xlu0 %3566 }
 0x70a   : > { %v3539_v26 = vpop.permute.xlu1 %3538 }
 0x70d   : > { %v3553_v41 = vpop.permute.xlu0 %3552 }
 0x70e   : > { %v3525_v3 = vpop.permute.xlu1 %3524 }
 0x711   : > { %v3513_v47 = vpop.permute.xlu0 %3512 }
 0x712   : > { %3517 = vst.msk [vmem:[%s5212_s20 + $0x7] sm:$0x1] %vm2118_vm12, %v3513_v47  ;;  %v3511_v10 = vpop.permute.xlu1 %3510 }
 0x713   : > { %3516 = vst.msk [vmem:[%s5212_s20 - $0x1] sm:$0xfe] %vm5392_vm0, %v3511_v10 }
 0x714   : > { %3530 = vst.msk [vmem:[%s5212_s20 - $0x2] sm:$0xfc] %vm2132_vm13, %v3525_v3 }
 0x715   : > { %3544 = vst.msk [vmem:[%s5212_s20 - $0x3] sm:$0xf8] %vm5393_vm2, %v3539_v26  ;;  %v3527_v6 = vpop.permute.xlu0 %3526 }
 0x716   : > { %3558 = vst.msk [vmem:[%s5212_s20 - $0x4] sm:$0xf0] %vm5394_vm3, %v3553_v41  ;;  %v3555_v18 = vpop.permute.xlu1 %3554 }
 0x717   : > { %3531 = vst.msk [vmem:[%s5212_s20 + $0x6] sm:$0x3] %vm5395_vm4, %v3527_v6 }
 0x718   : > { %3572 = vst.msk [vmem:[%s5212_s20 - $0x5] sm:$0xe0] %vm5396_vm5, %v3567_v20 }
 0x719   : > { %3586 = vst.msk [vmem:[%s5212_s20 - $0x6] sm:$0xc0] %vm5397_vm6, %v3581_v1 }
 0x72c   : > { %v3541_v63 = vpop.permute.xlu0 %3540  ;;  %v3569_v51 = vpop.permute.xlu1 %3568 }
 0x72d   : > { %3545 = vst.msk [vmem:[%s5212_s20 + $0x5] sm:$0x7] %vm5398_vm7, %v3541_v63 }
 0x72e   : > { %3559 = vst.msk [vmem:[%s5212_s20 + $0x4] sm:$0xf] %vm2166_vm15, %v3555_v18 }
 0x72f   : > { %3573 = vst.msk [vmem:[%s5212_s20 + $0x3] sm:$0x1f] %vm2182_vm1, %v3569_v51 }
 0x730   : > { %v3595_v57 = vpop.permute.xlu0 %3594  ;;  %v3583_v12 = vpop.permute.xlu1 %3582 }
 0x731   : > { %3600 = vst.msk [vmem:[%s5212_s20 - $0x7] sm:$0x80] %vm5399_vm8, %v3595_v57 }
 0x732   : > { %3587 = vst.msk [vmem:[%s5212_s20 + $0x2] sm:$0x3f] %vm2198_vm14, %v3583_v12 }
 0x734   : > { %v3597_v60 = vpop.permute.xlu1 %3596 }
 0x735   : > { %3601 = vst.msk [vmem:[%s5212_s20 + $0x1] sm:$0x7f] %vm2214_vm11, %v3597_v60 }
 0x736   : > { %4313 = shalt.err (!%p4310_p7)
}
 0x737   : > { %s4314_s28 = scalar_lea.hbm %s5310_s9, 128  ;;  %s4318_s18 = scalar_lea.hbm %s5355_s7, 512 }
 0x738   : > { %p4315_p8 = scmp.ne.s32.totalorder %s5310_s9, %s4314_s28  ;;  %p4319_p11 = scmp.lt.s32.totalorder %s5310_s9, %s5355_s7 }
 0x739   : > { %p4320_p12 = scmp.lt.s32.totalorder %s4318_s18, %s4314_s28 }
 0x73a   : > { %p4316_p9 = pnand %p4315_p8, %p4455_p5 }
 0x73b   : > { %p4321_p13 = por %p4320_p12, %p4319_p11 }
 0x73c   : > { %p4317_p10 = pneg %p4316_p9 }
 0x73e   : > { %p4322_p0 = pnand %p4321_p13, %p4317_p10 }
 0x740   : > { %4325 = shalt.err (!%p4322_p0)
}
 0x741   : > { %4158 = dma.vmem_to_hbm [thread:$0]  (%p4455_p5), %s3635_s13, 128, %s5310_s9, %s3608_s16  }
 0x742 PF: > { %p4168_p1 = scmp.ge.s32.totalorder %s4364_s27, 2  ;;  %s3646_s8 = sand.u32 1, %s4352_s24  }
 0x743   : > { %s3647_s22 = scalar_lea.sflag [#allocation3], %s3646_s8 }
 0x744   : > { %p4162_p2 = pnand %p4168_p1, %p4459_p6 }
 0x746   : > { %p4163_p3 = pneg %p4162_p2 }
 0x748   : > { %4343 = dma.done.wait (%p4163_p3), %s3647_s22, 128  }
 0x749   : > { %4345 = vsyncadd (%p4163_p3), %s3647_s22, 4294967168  ;;  %s3656_s23 = scalar_lea.sflag [#allocation5], %s3646_s8 }
 0x74a   : > { %4347 = dma.done.wait (%p4163_p3), %s3656_s23, 128  }
 0x74b   : > { %4349 = vsyncadd (%p4163_p3), %s3656_s23, 4294967168  ;;  %p21_p5 = scmp.ge.s32.totalorder %s4442_s30, 6   ;;  %s5401_s24 = smov %s4356_s25 }
 0x74c   : > { %s5402_s25 = smov %s4360_s26  ;;  %s5403_s26 = smov %s4453_s10 }
 0x74d   : > { %s5404_s27 = smov %s4442_s30  ;;  %23 = sbr.rel (!%p21_p5) target bundleno = 5 (0x5), region = 99 }
 0x752   :  { %3661 = vsyncpa [#allocation3], 1 }
 0x753   :  { %3663 = vsyncpa [#allocation3 + $0x1], 1 }
 0x754   :  { %3664 = vsyncpa [#allocation5], 1 }
 0x755   :  { %3666 = vsyncpa [#allocation5 + $0x1], 1 }

</bundles_post_ra>
